<compile_context>
chip_gen: v7x
topology: tpu7x:2x2x1
jax: 0.10.0
libtpu: 0.0.40
codegen_flags: <defaults>
</compile_context>

<pallas_src>
import math

import jax
import jax.numpy as jnp
from jax import lax
from jax.experimental import pallas as pl
from jax.experimental.pallas import tpu as pltpu

# ----------------------------- model config ---------------------------------
VOCAB = 100
TYPE_VOCAB = 2
MAX_POS = 32
HIDDEN = 32
NUM_HEADS = 4
HEAD_DIM = HIDDEN // NUM_HEADS
INTER = 64
NUM_LAYERS = 2
EPS = 1e-12
NEG = -10000.0  # HF-style additive mask value

SLAB_ROWS = 5
SLAB_COLS = 3 * HIDDEN  # 96 lanes; widest bias (bqkv) fits in one row


# ------------------------------ shared math ----------------------------------
def _layer_norm(x, g, b):
    mu = jnp.mean(x, axis=-1, keepdims=True)
    var = jnp.mean((x - mu) ** 2, axis=-1, keepdims=True)
    return (x - mu) * lax.rsqrt(var + EPS) * g + b


def _gelu(x):
    # TODO(synk): HF BERT uses erf-based GELU; tanh approximation used here.
    c = 0.7978845608028654  # sqrt(2/pi)
    return 0.5 * x * (1.0 + jnp.tanh(c * (x + 0.044715 * x * x * x)))


# ------------------------------ fused Pallas kernel --------------------------
def _make_kernel(S):
    scale = 1.0 / math.sqrt(HEAD_DIM)

    def kernel(emb_ref, mask_ref, slab_ref, wqkv_ref, wo_ref, w1_ref, w2_ref,
               out_ref):
        # emb_ref: (1, S, H)   mask_ref: (1, 1, S)   out_ref: (1, 1, H)
        mask = mask_ref[0]                                # (1, S) additive key mask
        emb_g = slab_ref[0, 4:5, 0:HIDDEN]
        emb_b = slab_ref[0, 4:5, HIDDEN:2 * HIDDEN]
        h = _layer_norm(emb_ref[0], emb_g, emb_b)         # (S, H)

        for l in range(NUM_LAYERS):                       # static unroll (tiny config)
            last = l == NUM_LAYERS - 1
            bqkv = slab_ref[l, 0:1, :]                    # (1, 3H)
            b1 = slab_ref[l, 1:2, 0:INTER]                # (1, INTER)
            bo = slab_ref[l, 2:3, 0:HIDDEN]
            ln1_g = slab_ref[l, 2:3, HIDDEN:2 * HIDDEN]
            ln1_b = slab_ref[l, 2:3, 2 * HIDDEN:3 * HIDDEN]
            b2 = slab_ref[l, 3:4, 0:HIDDEN]
            ln2_g = slab_ref[l, 3:4, HIDDEN:2 * HIDDEN]
            ln2_b = slab_ref[l, 3:4, 2 * HIDDEN:3 * HIDDEN]

            # ---- one lane-dense QKV projection: (S,H) @ (H,3H) ----
            qkv = jnp.dot(h, wqkv_ref[l],
                          preferred_element_type=jnp.float32) + bqkv   # (S, 3H)

            # only the CLS query row matters in the last layer
            if last:
                q_rows = qkv[0:1, 0:HIDDEN]               # (1, H)
                h_res = h[0:1, :]                         # (1, H)
            else:
                q_rows = qkv[:, 0:HIDDEN]                 # (S, H)
                h_res = h

            # ---- per-head attention (tiny (R,S) tiles), heads concatenated on lanes ----
            ctx_heads = []
            for n in range(NUM_HEADS):
                lo = n * HEAD_DIM
                q_h = q_rows[:, lo:lo + HEAD_DIM]                          # (R, HD)
                k_h = qkv[:, HIDDEN + lo:HIDDEN + lo + HEAD_DIM]           # (S, HD)
                v_h = qkv[:, 2 * HIDDEN + lo:2 * HIDDEN + lo + HEAD_DIM]   # (S, HD)
                s = lax.dot_general(
                    q_h, k_h, dimension_numbers=(((1,), (1,)), ((), ())),
                    preferred_element_type=jnp.float32) * scale            # (R, S)
                s = s + mask
                s = s - jnp.max(s, axis=-1, keepdims=True)
                p = jnp.exp(s)
                p = p * pl.reciprocal(jnp.sum(p, axis=-1, keepdims=True),
                                      approx=True)
                ctx_heads.append(jnp.dot(p, v_h,
                                         preferred_element_type=jnp.float32))
            ctx = jnp.concatenate(ctx_heads, axis=-1)                      # (R, H)

            # ---- fused output projection: single (R,H) @ (H,H) ----
            attn = jnp.dot(ctx, wo_ref[l],
                           preferred_element_type=jnp.float32) + bo
            h1 = _layer_norm(h_res + attn, ln1_g, ln1_b)

            # ---- feed-forward ----
            ff = jnp.dot(h1, w1_ref[l], preferred_element_type=jnp.float32) + b1
            ff = _gelu(ff)
            ff = jnp.dot(ff, w2_ref[l], preferred_element_type=jnp.float32) + b2
            h = _layer_norm(h1 + ff, ln2_g, ln2_b)

        out_ref[0] = h                                    # (1, H): CLS hidden state

    return kernel


def pallas_bert_forward(emb, mask_add, packed):
    B, S, _ = emb.shape
    kernel = _make_kernel(S)
    wconst = lambda b: (0, 0, 0)   # weights: same block for every grid program
    out = pl.pallas_call(
        kernel,
        out_shape=jax.ShapeDtypeStruct((B, 1, HIDDEN), jnp.float32),
        grid=(B,),
        in_specs=[
            pl.BlockSpec((1, S, HIDDEN), lambda b: (b, 0, 0)),             # embeddings
            pl.BlockSpec((1, 1, S), lambda b: (b, 0, 0)),                  # additive mask
            pl.BlockSpec((NUM_LAYERS, SLAB_ROWS, SLAB_COLS), wconst),      # bias/LN slab
            pl.BlockSpec((NUM_LAYERS, HIDDEN, 3 * HIDDEN), wconst),        # wqkv
            pl.BlockSpec((NUM_LAYERS, HIDDEN, HIDDEN), wconst),            # wo
            pl.BlockSpec((NUM_LAYERS, HIDDEN, INTER), wconst),             # w1
            pl.BlockSpec((NUM_LAYERS, INTER, HIDDEN), wconst),             # w2
        ],
        out_specs=pl.BlockSpec((1, 1, HIDDEN), lambda b: (b, 0, 0)),
        compiler_params=pltpu.CompilerParams(
            dimension_semantics=("parallel",)),
    )(emb, mask_add, packed["slab"], packed["wqkv"], packed["wo"],
      packed["w1"], packed["w2"])
    return out[:, 0, :]                                    # (B, H)


# ------------------------------ params ---------------------------------------
def init_params(key):
    keys = iter(jax.random.split(key, 64))

    def dense(shape):
        return (0.02 * jax.random.normal(next(keys), shape)).astype(jnp.float32)

    params = {
        "word_emb": dense((VOCAB, HIDDEN)),
        "pos_emb": dense((MAX_POS, HIDDEN)),
        "type_emb": dense((TYPE_VOCAB, HIDDEN)),
        "emb_ln_g": jnp.ones((HIDDEN,), jnp.float32),
        "emb_ln_b": jnp.zeros((HIDDEN,), jnp.float32),
        "layers": [],
    }
    for _ in range(NUM_LAYERS):
        params["layers"].append({
            "wq": dense((HIDDEN, HIDDEN)), "bq": jnp.zeros((HIDDEN,), jnp.float32),
            "wk": dense((HIDDEN, HIDDEN)), "bk": jnp.zeros((HIDDEN,), jnp.float32),
            "wv": dense((HIDDEN, HIDDEN)), "bv": jnp.zeros((HIDDEN,), jnp.float32),
            "wo": dense((HIDDEN, HIDDEN)), "bo": jnp.zeros((HIDDEN,), jnp.float32),
            "ln1_g": jnp.ones((HIDDEN,), jnp.float32),
            "ln1_b": jnp.zeros((HIDDEN,), jnp.float32),
            "w1": dense((HIDDEN, INTER)), "b1": jnp.zeros((INTER,), jnp.float32),
            "w2": dense((INTER, HIDDEN)), "b2": jnp.zeros((HIDDEN,), jnp.float32),
            "ln2_g": jnp.ones((HIDDEN,), jnp.float32),
            "ln2_b": jnp.zeros((HIDDEN,), jnp.float32),
        })
    return params


def pack_params(params):
    """Stack per-layer weights over a leading layer axis, fuse Q/K/V column-wise,
    and pack all bias / LayerNorm vectors lane-major into one f32 slab."""
    wqkv, wo, w1, w2, slabs = [], [], [], [], []
    for i, lp in enumerate(params["layers"]):
        wqkv.append(jnp.concatenate([lp["wq"], lp["wk"], lp["wv"]], axis=1))  # (H, 3H)
        wo.append(lp["wo"])
        w1.append(lp["w1"])
        w2.append(lp["w2"])
        slab = jnp.zeros((SLAB_ROWS, SLAB_COLS), jnp.float32)
        slab = slab.at[0, :].set(jnp.concatenate([lp["bq"], lp["bk"], lp["bv"]]))
        slab = slab.at[1, :INTER].set(lp["b1"])
        slab = slab.at[2, 0:HIDDEN].set(lp["bo"])
        slab = slab.at[2, HIDDEN:2 * HIDDEN].set(lp["ln1_g"])
        slab = slab.at[2, 2 * HIDDEN:3 * HIDDEN].set(lp["ln1_b"])
        slab = slab.at[3, 0:HIDDEN].set(lp["b2"])
        slab = slab.at[3, HIDDEN:2 * HIDDEN].set(lp["ln2_g"])
        slab = slab.at[3, 2 * HIDDEN:3 * HIDDEN].set(lp["ln2_b"])
        if i == 0:  # embedding LayerNorm lives in layer-0's spare row
            slab = slab.at[4, 0:HIDDEN].set(params["emb_ln_g"])
            slab = slab.at[4, HIDDEN:2 * HIDDEN].set(params["emb_ln_b"])
        slabs.append(slab)
    return {
        "word_emb": params["word_emb"],
        "pos_emb": params["pos_emb"],
        "type_emb": params["type_emb"],
        "wqkv": jnp.stack(wqkv, 0),   # (L, H, 3H) f32
        "wo": jnp.stack(wo, 0),       # (L, H, H)  f32
        "w1": jnp.stack(w1, 0),       # (L, H, INTER) f32
        "w2": jnp.stack(w2, 0),       # (L, INTER, H) f32
        "slab": jnp.stack(slabs, 0),  # (L, 5, 96) f32 biases + LayerNorm params
    }


# ------------------------------ BertWrapper.forward ---------------------------
def bert_wrapper_forward(packed, input_ids_3d, attn_mask_3d, token_type_3d):
    # mirror BertWrapper.forward: squeeze dim 1, cast long / float / long
    input_ids = jnp.squeeze(input_ids_3d, axis=1).astype(jnp.int32)
    attn_mask = jnp.squeeze(attn_mask_3d, axis=1).astype(jnp.float32)
    token_type = jnp.squeeze(token_type_3d, axis=1).astype(jnp.int32)
    B, S = input_ids.shape

    # embeddings (gather = plain-JAX glue); LayerNorm happens inside the kernel
    emb = (packed["word_emb"][input_ids]
           + packed["pos_emb"][jnp.arange(S)][None, :, :]
           + packed["type_emb"][token_type]).astype(jnp.float32)      # (B, S, H)

    # HF-style additive key mask, per batch element: (B, 1, S)
    mask_add = ((1.0 - attn_mask) * NEG).reshape(B, 1, S)

    # fused kernel returns last_hidden_state[:, 0, :]
    return pallas_bert_forward(emb, mask_add, packed)


# ------------------------------ pure-JAX reference ----------------------------
def bert_reference(params, input_ids_3d, attn_mask_3d, token_type_3d):
    input_ids = jnp.squeeze(input_ids_3d, axis=1).astype(jnp.int32)
    attn_mask = jnp.squeeze(attn_mask_3d, axis=1).astype(jnp.float32)
    token_type = jnp.squeeze(token_type_3d, axis=1).astype(jnp.int32)
    B, S = input_ids.shape
    emb = (params["word_emb"][input_ids]
           + params["pos_emb"][jnp.arange(S)][None, :, :]
           + params["type_emb"][token_type])
    h = _layer_norm(emb, params["emb_ln_g"], params["emb_ln_b"])
    mask_add = ((1.0 - attn_mask) * NEG)[:, None, None, :]
    scale = 1.0 / math.sqrt(HEAD_DIM)

    def heads(x):
        return x.reshape(B, S, NUM_HEADS, HEAD_DIM).transpose(0, 2, 1, 3)

    for lp in params["layers"]:
        q = heads(h @ lp["wq"] + lp["bq"])
        k = heads(h @ lp["wk"] + lp["bk"])
        v = heads(h @ lp["wv"] + lp["bv"])
        s = jnp.einsum("bhqd,bhkd->bhqk", q, k) * scale + mask_add
        p = jax.nn.softmax(s, axis=-1)
        ctx = jnp.einsum("bhqk,bhkd->bhqd", p, v).transpose(0, 2, 1, 3).reshape(B, S, HIDDEN)
        attn = ctx @ lp["wo"] + lp["bo"]
        h1 = _layer_norm(h + attn, lp["ln1_g"], lp["ln1_b"])
        ff = _gelu(h1 @ lp["w1"] + lp["b1"]) @ lp["w2"] + lp["b2"]
        h = _layer_norm(h1 + ff, lp["ln2_g"], lp["ln2_b"])
    return h[:, 0, :]


# ------------------------------ main ------------------------------------------
if __name__ == "__main__":
    key = jax.random.PRNGKey(0)
    k_param, k_ids, k_types = jax.random.split(key, 3)

    B, S = 2, 8
    params = init_params(k_param)
    packed = pack_params(params)

    # inputs as the wrapper receives them: (B, 1, S) each
    input_ids = jax.random.randint(k_ids, (B, 1, S), 0, VOCAB, dtype=jnp.int32)
    attention_mask = jnp.ones((B, 1, S), dtype=jnp.float32)
    attention_mask = attention_mask.at[:, :, S - 2:].set(0.0)  # some padding
    token_type_ids = jax.random.randint(k_types, (B, 1, S), 0, TYPE_VOCAB,
                                        dtype=jnp.int32)

    out = bert_wrapper_forward(packed, input_ids, attention_mask, token_type_ids)
    out = jax.block_until_ready(out)
    assert out.shape == (B, HIDDEN) and out.dtype == jnp.float32
    assert bool(jnp.all(jnp.isfinite(out)))

    # correctness check vs. pure-f32 JAX reference (approx softmax reciprocal
    # in the kernel -> modest tolerance)
    ref = bert_reference(params, input_ids, attention_mask, token_type_ids)
    err = float(jnp.max(jnp.abs(out - ref)))
    assert err < 2e-2, f"mismatch vs reference: {err}"

    print("KERNEL_OK")
</pallas_src>

<mosaic_0001>
module attributes {stable_mosaic.version = 11 : i64} {
  func.func @kernel(%arg0: i32, %arg1: memref<1x8x32xf32, #tpu.memory_space<vmem>>, %arg2: memref<1x1x8xf32, #tpu.memory_space<vmem>>, %arg3: memref<2x5x96xf32, #tpu.memory_space<vmem>>, %arg4: memref<2x32x96xf32, #tpu.memory_space<vmem>>, %arg5: memref<2x32x32xf32, #tpu.memory_space<vmem>>, %arg6: memref<2x32x64xf32, #tpu.memory_space<vmem>>, %arg7: memref<2x64x32xf32, #tpu.memory_space<vmem>>, %arg8: memref<1x1x32xf32, #tpu.memory_space<vmem>>) attributes {dimension_semantics = [#tpu.dimension_semantics<parallel>], iteration_bounds = array<i64: 2>, scalar_prefetch = 0 : i64, scratch_operands = 0 : i64, tpu.core_type = #tpu.core_type<tc>, window_params = [{transform_indices = @transform_0, window_bounds = array<i64: 1, 8, 32>}, {transform_indices = @transform_1, window_bounds = array<i64: 1, 1, 8>}, {pipeline_mode = #tpu.pipeline_mode<synchronous>, transform_indices = @transform_2, window_bounds = array<i64: 2, 5, 96>}, {pipeline_mode = #tpu.pipeline_mode<synchronous>, transform_indices = @transform_3, window_bounds = array<i64: 2, 32, 96>}, {pipeline_mode = #tpu.pipeline_mode<synchronous>, transform_indices = @transform_4, window_bounds = array<i64: 2, 32, 32>}, {pipeline_mode = #tpu.pipeline_mode<synchronous>, transform_indices = @transform_5, window_bounds = array<i64: 2, 32, 64>}, {pipeline_mode = #tpu.pipeline_mode<synchronous>, transform_indices = @transform_6, window_bounds = array<i64: 2, 64, 32>}, {transform_indices = @transform_7, window_bounds = array<i64: 1, 1, 32>}]} {
    %c0 = arith.constant 0 : index
    %c0_0 = arith.constant 0 : index
    %c0_1 = arith.constant 0 : index
    %0 = vector.load %arg2[%c0, %c0_0, %c0_1] : memref<1x1x8xf32, #tpu.memory_space<vmem>>, vector<1x1x8xf32>
    %1 = vector.shape_cast %0 : vector<1x1x8xf32> to vector<1x8xf32>
    %c0_2 = arith.constant 0 : index
    %c4 = arith.constant 4 : index
    %c0_3 = arith.constant 0 : index
    %2 = vector.load %arg3[%c0_2, %c4, %c0_3] : memref<2x5x96xf32, #tpu.memory_space<vmem>>, vector<1x1x32xf32>
    %3 = vector.shape_cast %2 : vector<1x1x32xf32> to vector<1x32xf32>
    %c0_4 = arith.constant 0 : index
    %c4_5 = arith.constant 4 : index
    %c32 = arith.constant 32 : index
    %4 = vector.load %arg3[%c0_4, %c4_5, %c32] : memref<2x5x96xf32, #tpu.memory_space<vmem>>, vector<1x1x32xf32>
    %5 = vector.shape_cast %4 : vector<1x1x32xf32> to vector<1x32xf32>
    %c0_6 = arith.constant 0 : index
    %c0_7 = arith.constant 0 : index
    %c0_8 = arith.constant 0 : index
    %6 = vector.load %arg1[%c0_6, %c0_7, %c0_8] : memref<1x8x32xf32, #tpu.memory_space<vmem>>, vector<1x8x32xf32>
    %7 = vector.shape_cast %6 : vector<1x8x32xf32> to vector<8x32xf32>
    %cst = arith.constant dense<0.000000e+00> : vector<8xf32>
    %8 = vector.multi_reduction <add>, %7, %cst [1] : vector<8x32xf32> to vector<8xf32>
    %9 = vector.shape_cast %8 : vector<8xf32> to vector<8x1xf32>
    %cst_9 = arith.constant 3.200000e+01 : f32
    %10 = vector.broadcast %cst_9 : f32 to vector<8x1xf32>
    %11 = arith.divf %9, %10 : vector<8x1xf32>
    %12 = vector.broadcast %11 : vector<8x1xf32> to vector<8x32xf32>
    %13 = arith.subf %7, %12 : vector<8x32xf32>
    %14 = arith.mulf %13, %13 : vector<8x32xf32>
    %cst_10 = arith.constant dense<0.000000e+00> : vector<8xf32>
    %15 = vector.multi_reduction <add>, %14, %cst_10 [1] : vector<8x32xf32> to vector<8xf32>
    %16 = vector.shape_cast %15 : vector<8xf32> to vector<8x1xf32>
    %cst_11 = arith.constant 3.200000e+01 : f32
    %17 = vector.broadcast %cst_11 : f32 to vector<8x1xf32>
    %18 = arith.divf %16, %17 : vector<8x1xf32>
    %19 = vector.broadcast %11 : vector<8x1xf32> to vector<8x32xf32>
    %20 = arith.subf %7, %19 : vector<8x32xf32>
    %cst_12 = arith.constant 9.99999996E-13 : f32
    %21 = vector.broadcast %cst_12 : f32 to vector<8x1xf32>
    %22 = arith.addf %18, %21 : vector<8x1xf32>
    %23 = math.rsqrt %22 : vector<8x1xf32>
    %24 = vector.broadcast %23 : vector<8x1xf32> to vector<8x32xf32>
    %25 = arith.mulf %20, %24 : vector<8x32xf32>
    %26 = vector.broadcast %3 : vector<1x32xf32> to vector<8x32xf32>
    %27 = arith.mulf %25, %26 : vector<8x32xf32>
    %28 = vector.broadcast %5 : vector<1x32xf32> to vector<8x32xf32>
    %29 = arith.addf %27, %28 : vector<8x32xf32>
    %c0_13 = arith.constant 0 : index
    %c0_14 = arith.constant 0 : index
    %c0_15 = arith.constant 0 : index
    %30 = vector.load %arg3[%c0_13, %c0_14, %c0_15] : memref<2x5x96xf32, #tpu.memory_space<vmem>>, vector<1x1x96xf32>
    %31 = vector.shape_cast %30 : vector<1x1x96xf32> to vector<1x96xf32>
    %c0_16 = arith.constant 0 : index
    %c1 = arith.constant 1 : index
    %c0_17 = arith.constant 0 : index
    %32 = vector.load %arg3[%c0_16, %c1, %c0_17] : memref<2x5x96xf32, #tpu.memory_space<vmem>>, vector<1x1x64xf32>
    %33 = vector.shape_cast %32 : vector<1x1x64xf32> to vector<1x64xf32>
    %c0_18 = arith.constant 0 : index
    %c2 = arith.constant 2 : index
    %c0_19 = arith.constant 0 : index
    %34 = vector.load %arg3[%c0_18, %c2, %c0_19] : memref<2x5x96xf32, #tpu.memory_space<vmem>>, vector<1x1x32xf32>
    %35 = vector.shape_cast %34 : vector<1x1x32xf32> to vector<1x32xf32>
    %c0_20 = arith.constant 0 : index
    %c2_21 = arith.constant 2 : index
    %c32_22 = arith.constant 32 : index
    %36 = vector.load %arg3[%c0_20, %c2_21, %c32_22] : memref<2x5x96xf32, #tpu.memory_space<vmem>>, vector<1x1x32xf32>
    %37 = vector.shape_cast %36 : vector<1x1x32xf32> to vector<1x32xf32>
    %c0_23 = arith.constant 0 : index
    %c2_24 = arith.constant 2 : index
    %c64 = arith.constant 64 : index
    %38 = vector.load %arg3[%c0_23, %c2_24, %c64] : memref<2x5x96xf32, #tpu.memory_space<vmem>>, vector<1x1x32xf32>
    %39 = vector.shape_cast %38 : vector<1x1x32xf32> to vector<1x32xf32>
    %c0_25 = arith.constant 0 : index
    %c3 = arith.constant 3 : index
    %c0_26 = arith.constant 0 : index
    %40 = vector.load %arg3[%c0_25, %c3, %c0_26] : memref<2x5x96xf32, #tpu.memory_space<vmem>>, vector<1x1x32xf32>
    %41 = vector.shape_cast %40 : vector<1x1x32xf32> to vector<1x32xf32>
    %c0_27 = arith.constant 0 : index
    %c3_28 = arith.constant 3 : index
    %c32_29 = arith.constant 32 : index
    %42 = vector.load %arg3[%c0_27, %c3_28, %c32_29] : memref<2x5x96xf32, #tpu.memory_space<vmem>>, vector<1x1x32xf32>
    %43 = vector.shape_cast %42 : vector<1x1x32xf32> to vector<1x32xf32>
    %c0_30 = arith.constant 0 : index
    %c3_31 = arith.constant 3 : index
    %c64_32 = arith.constant 64 : index
    %44 = vector.load %arg3[%c0_30, %c3_31, %c64_32] : memref<2x5x96xf32, #tpu.memory_space<vmem>>, vector<1x1x32xf32>
    %45 = vector.shape_cast %44 : vector<1x1x32xf32> to vector<1x32xf32>
    %c0_33 = arith.constant 0 : index
    %c0_34 = arith.constant 0 : index
    %c0_35 = arith.constant 0 : index
    %46 = vector.load %arg4[%c0_33, %c0_34, %c0_35] : memref<2x32x96xf32, #tpu.memory_space<vmem>>, vector<1x32x96xf32>
    %47 = vector.shape_cast %46 : vector<1x32x96xf32> to vector<32x96xf32>
    %cst_36 = arith.constant dense<0.000000e+00> : vector<8x96xf32>
    %48 = tpu.matmul %29, %47, %cst_36 {dimension_numbers = #tpu.dot_dimension_numbers<[1], [0], [0], [1], [0, 0, 1, 1], [], []>} : vector<8x32xf32>, vector<32x96xf32>, vector<8x96xf32> -> vector<8x96xf32>
    %49 = vector.broadcast %31 : vector<1x96xf32> to vector<8x96xf32>
    %50 = arith.addf %48, %49 : vector<8x96xf32>
    %51 = vector.extract_strided_slice %50 {offsets = [0, 0], sizes = [8, 32], strides = [1, 1]} : vector<8x96xf32> to vector<8x32xf32>
    %52 = vector.extract_strided_slice %51 {offsets = [0, 0], sizes = [8, 8], strides = [1, 1]} : vector<8x32xf32> to vector<8x8xf32>
    %53 = vector.extract_strided_slice %50 {offsets = [0, 32], sizes = [8, 8], strides = [1, 1]} : vector<8x96xf32> to vector<8x8xf32>
    %54 = vector.extract_strided_slice %50 {offsets = [0, 64], sizes = [8, 8], strides = [1, 1]} : vector<8x96xf32> to vector<8x8xf32>
    %cst_37 = arith.constant dense<0.000000e+00> : vector<8x8xf32>
    %55 = tpu.matmul %52, %53, %cst_37 {dimension_numbers = #tpu.dot_dimension_numbers<[1], [1], [0], [0], [0, 0, 1, 0], [], []>} : vector<8x8xf32>, vector<8x8xf32>, vector<8x8xf32> -> vector<8x8xf32>
    %cst_38 = arith.constant 0.353553385 : f32
    %56 = vector.broadcast %cst_38 : f32 to vector<8x8xf32>
    %57 = arith.mulf %55, %56 : vector<8x8xf32>
    %58 = vector.broadcast %1 : vector<1x8xf32> to vector<8x8xf32>
    %59 = arith.addf %57, %58 : vector<8x8xf32>
    %cst_39 = arith.constant dense<0xFF800000> : vector<8xf32>
    %60 = vector.multi_reduction <maximumf>, %59, %cst_39 [1] : vector<8x8xf32> to vector<8xf32>
    %61 = vector.shape_cast %60 : vector<8xf32> to vector<8x1xf32>
    %62 = vector.broadcast %61 : vector<8x1xf32> to vector<8x8xf32>
    %63 = arith.subf %59, %62 : vector<8x8xf32>
    %64 = math.exp %63 : vector<8x8xf32>
    %cst_40 = arith.constant dense<0.000000e+00> : vector<8xf32>
    %65 = vector.multi_reduction <add>, %64, %cst_40 [1] : vector<8x8xf32> to vector<8xf32>
    %66 = vector.shape_cast %65 : vector<8xf32> to vector<8x1xf32>
    %67 = tpu.reciprocal %66 {approx = true} : vector<8x1xf32> -> vector<8x1xf32>
    %68 = vector.broadcast %67 : vector<8x1xf32> to vector<8x8xf32>
    %69 = arith.mulf %64, %68 : vector<8x8xf32>
    %cst_41 = arith.constant dense<0.000000e+00> : vector<8x8xf32>
    %70 = tpu.matmul %69, %54, %cst_41 {dimension_numbers = #tpu.dot_dimension_numbers<[1], [0], [0], [1], [0, 0, 1, 1], [], []>} : vector<8x8xf32>, vector<8x8xf32>, vector<8x8xf32> -> vector<8x8xf32>
    %71 = vector.extract_strided_slice %51 {offsets = [0, 8], sizes = [8, 8], strides = [1, 1]} : vector<8x32xf32> to vector<8x8xf32>
    %72 = vector.extract_strided_slice %50 {offsets = [0, 40], sizes = [8, 8], strides = [1, 1]} : vector<8x96xf32> to vector<8x8xf32>
    %73 = vector.extract_strided_slice %50 {offsets = [0, 72], sizes = [8, 8], strides = [1, 1]} : vector<8x96xf32> to vector<8x8xf32>
    %cst_42 = arith.constant dense<0.000000e+00> : vector<8x8xf32>
    %74 = tpu.matmul %71, %72, %cst_42 {dimension_numbers = #tpu.dot_dimension_numbers<[1], [1], [0], [0], [0, 0, 1, 0], [], []>} : vector<8x8xf32>, vector<8x8xf32>, vector<8x8xf32> -> vector<8x8xf32>
    %cst_43 = arith.constant 0.353553385 : f32
    %75 = vector.broadcast %cst_43 : f32 to vector<8x8xf32>
    %76 = arith.mulf %74, %75 : vector<8x8xf32>
    %77 = vector.broadcast %1 : vector<1x8xf32> to vector<8x8xf32>
    %78 = arith.addf %76, %77 : vector<8x8xf32>
    %cst_44 = arith.constant dense<0xFF800000> : vector<8xf32>
    %79 = vector.multi_reduction <maximumf>, %78, %cst_44 [1] : vector<8x8xf32> to vector<8xf32>
    %80 = vector.shape_cast %79 : vector<8xf32> to vector<8x1xf32>
    %81 = vector.broadcast %80 : vector<8x1xf32> to vector<8x8xf32>
    %82 = arith.subf %78, %81 : vector<8x8xf32>
    %83 = math.exp %82 : vector<8x8xf32>
    %cst_45 = arith.constant dense<0.000000e+00> : vector<8xf32>
    %84 = vector.multi_reduction <add>, %83, %cst_45 [1] : vector<8x8xf32> to vector<8xf32>
    %85 = vector.shape_cast %84 : vector<8xf32> to vector<8x1xf32>
    %86 = tpu.reciprocal %85 {approx = true} : vector<8x1xf32> -> vector<8x1xf32>
    %87 = vector.broadcast %86 : vector<8x1xf32> to vector<8x8xf32>
    %88 = arith.mulf %83, %87 : vector<8x8xf32>
    %cst_46 = arith.constant dense<0.000000e+00> : vector<8x8xf32>
    %89 = tpu.matmul %88, %73, %cst_46 {dimension_numbers = #tpu.dot_dimension_numbers<[1], [0], [0], [1], [0, 0, 1, 1], [], []>} : vector<8x8xf32>, vector<8x8xf32>, vector<8x8xf32> -> vector<8x8xf32>
    %90 = vector.extract_strided_slice %51 {offsets = [0, 16], sizes = [8, 8], strides = [1, 1]} : vector<8x32xf32> to vector<8x8xf32>
    %91 = vector.extract_strided_slice %50 {offsets = [0, 48], sizes = [8, 8], strides = [1, 1]} : vector<8x96xf32> to vector<8x8xf32>
    %92 = vector.extract_strided_slice %50 {offsets = [0, 80], sizes = [8, 8], strides = [1, 1]} : vector<8x96xf32> to vector<8x8xf32>
    %cst_47 = arith.constant dense<0.000000e+00> : vector<8x8xf32>
    %93 = tpu.matmul %90, %91, %cst_47 {dimension_numbers = #tpu.dot_dimension_numbers<[1], [1], [0], [0], [0, 0, 1, 0], [], []>} : vector<8x8xf32>, vector<8x8xf32>, vector<8x8xf32> -> vector<8x8xf32>
    %cst_48 = arith.constant 0.353553385 : f32
    %94 = vector.broadcast %cst_48 : f32 to vector<8x8xf32>
    %95 = arith.mulf %93, %94 : vector<8x8xf32>
    %96 = vector.broadcast %1 : vector<1x8xf32> to vector<8x8xf32>
    %97 = arith.addf %95, %96 : vector<8x8xf32>
    %cst_49 = arith.constant dense<0xFF800000> : vector<8xf32>
    %98 = vector.multi_reduction <maximumf>, %97, %cst_49 [1] : vector<8x8xf32> to vector<8xf32>
    %99 = vector.shape_cast %98 : vector<8xf32> to vector<8x1xf32>
    %100 = vector.broadcast %99 : vector<8x1xf32> to vector<8x8xf32>
    %101 = arith.subf %97, %100 : vector<8x8xf32>
    %102 = math.exp %101 : vector<8x8xf32>
    %cst_50 = arith.constant dense<0.000000e+00> : vector<8xf32>
    %103 = vector.multi_reduction <add>, %102, %cst_50 [1] : vector<8x8xf32> to vector<8xf32>
    %104 = vector.shape_cast %103 : vector<8xf32> to vector<8x1xf32>
    %105 = tpu.reciprocal %104 {approx = true} : vector<8x1xf32> -> vector<8x1xf32>
    %106 = vector.broadcast %105 : vector<8x1xf32> to vector<8x8xf32>
    %107 = arith.mulf %102, %106 : vector<8x8xf32>
    %cst_51 = arith.constant dense<0.000000e+00> : vector<8x8xf32>
    %108 = tpu.matmul %107, %92, %cst_51 {dimension_numbers = #tpu.dot_dimension_numbers<[1], [0], [0], [1], [0, 0, 1, 1], [], []>} : vector<8x8xf32>, vector<8x8xf32>, vector<8x8xf32> -> vector<8x8xf32>
    %109 = vector.extract_strided_slice %51 {offsets = [0, 24], sizes = [8, 8], strides = [1, 1]} : vector<8x32xf32> to vector<8x8xf32>
    %110 = vector.extract_strided_slice %50 {offsets = [0, 56], sizes = [8, 8], strides = [1, 1]} : vector<8x96xf32> to vector<8x8xf32>
    %111 = vector.extract_strided_slice %50 {offsets = [0, 88], sizes = [8, 8], strides = [1, 1]} : vector<8x96xf32> to vector<8x8xf32>
    %cst_52 = arith.constant dense<0.000000e+00> : vector<8x8xf32>
    %112 = tpu.matmul %109, %110, %cst_52 {dimension_numbers = #tpu.dot_dimension_numbers<[1], [1], [0], [0], [0, 0, 1, 0], [], []>} : vector<8x8xf32>, vector<8x8xf32>, vector<8x8xf32> -> vector<8x8xf32>
    %cst_53 = arith.constant 0.353553385 : f32
    %113 = vector.broadcast %cst_53 : f32 to vector<8x8xf32>
    %114 = arith.mulf %112, %113 : vector<8x8xf32>
    %115 = vector.broadcast %1 : vector<1x8xf32> to vector<8x8xf32>
    %116 = arith.addf %114, %115 : vector<8x8xf32>
    %cst_54 = arith.constant dense<0xFF800000> : vector<8xf32>
    %117 = vector.multi_reduction <maximumf>, %116, %cst_54 [1] : vector<8x8xf32> to vector<8xf32>
    %118 = vector.shape_cast %117 : vector<8xf32> to vector<8x1xf32>
    %119 = vector.broadcast %118 : vector<8x1xf32> to vector<8x8xf32>
    %120 = arith.subf %116, %119 : vector<8x8xf32>
    %121 = math.exp %120 : vector<8x8xf32>
    %cst_55 = arith.constant dense<0.000000e+00> : vector<8xf32>
    %122 = vector.multi_reduction <add>, %121, %cst_55 [1] : vector<8x8xf32> to vector<8xf32>
    %123 = vector.shape_cast %122 : vector<8xf32> to vector<8x1xf32>
    %124 = tpu.reciprocal %123 {approx = true} : vector<8x1xf32> -> vector<8x1xf32>
    %125 = vector.broadcast %124 : vector<8x1xf32> to vector<8x8xf32>
    %126 = arith.mulf %121, %125 : vector<8x8xf32>
    %cst_56 = arith.constant dense<0.000000e+00> : vector<8x8xf32>
    %127 = tpu.matmul %126, %111, %cst_56 {dimension_numbers = #tpu.dot_dimension_numbers<[1], [0], [0], [1], [0, 0, 1, 1], [], []>} : vector<8x8xf32>, vector<8x8xf32>, vector<8x8xf32> -> vector<8x8xf32>
    %128 = tpu.concatenate %70, %89, %108, %127 in 1 : vector<8x8xf32>, vector<8x8xf32>, vector<8x8xf32>, vector<8x8xf32> -> vector<8x32xf32>
    %c0_57 = arith.constant 0 : index
    %c0_58 = arith.constant 0 : index
    %c0_59 = arith.constant 0 : index
    %129 = vector.load %arg5[%c0_57, %c0_58, %c0_59] : memref<2x32x32xf32, #tpu.memory_space<vmem>>, vector<1x32x32xf32>
    %130 = vector.shape_cast %129 : vector<1x32x32xf32> to vector<32x32xf32>
    %cst_60 = arith.constant dense<0.000000e+00> : vector<8x32xf32>
    %131 = tpu.matmul %128, %130, %cst_60 {dimension_numbers = #tpu.dot_dimension_numbers<[1], [0], [0], [1], [0, 0, 1, 1], [], []>} : vector<8x32xf32>, vector<32x32xf32>, vector<8x32xf32> -> vector<8x32xf32>
    %132 = vector.broadcast %35 : vector<1x32xf32> to vector<8x32xf32>
    %133 = arith.addf %131, %132 : vector<8x32xf32>
    %134 = arith.addf %29, %133 : vector<8x32xf32>
    %cst_61 = arith.constant dense<0.000000e+00> : vector<8xf32>
    %135 = vector.multi_reduction <add>, %134, %cst_61 [1] : vector<8x32xf32> to vector<8xf32>
    %136 = vector.shape_cast %135 : vector<8xf32> to vector<8x1xf32>
    %cst_62 = arith.constant 3.200000e+01 : f32
    %137 = vector.broadcast %cst_62 : f32 to vector<8x1xf32>
    %138 = arith.divf %136, %137 : vector<8x1xf32>
    %139 = vector.broadcast %138 : vector<8x1xf32> to vector<8x32xf32>
    %140 = arith.subf %134, %139 : vector<8x32xf32>
    %141 = arith.mulf %140, %140 : vector<8x32xf32>
    %cst_63 = arith.constant dense<0.000000e+00> : vector<8xf32>
    %142 = vector.multi_reduction <add>, %141, %cst_63 [1] : vector<8x32xf32> to vector<8xf32>
    %143 = vector.shape_cast %142 : vector<8xf32> to vector<8x1xf32>
    %cst_64 = arith.constant 3.200000e+01 : f32
    %144 = vector.broadcast %cst_64 : f32 to vector<8x1xf32>
    %145 = arith.divf %143, %144 : vector<8x1xf32>
    %146 = vector.broadcast %138 : vector<8x1xf32> to vector<8x32xf32>
    %147 = arith.subf %134, %146 : vector<8x32xf32>
    %cst_65 = arith.constant 9.99999996E-13 : f32
    %148 = vector.broadcast %cst_65 : f32 to vector<8x1xf32>
    %149 = arith.addf %145, %148 : vector<8x1xf32>
    %150 = math.rsqrt %149 : vector<8x1xf32>
    %151 = vector.broadcast %150 : vector<8x1xf32> to vector<8x32xf32>
    %152 = arith.mulf %147, %151 : vector<8x32xf32>
    %153 = vector.broadcast %37 : vector<1x32xf32> to vector<8x32xf32>
    %154 = arith.mulf %152, %153 : vector<8x32xf32>
    %155 = vector.broadcast %39 : vector<1x32xf32> to vector<8x32xf32>
    %156 = arith.addf %154, %155 : vector<8x32xf32>
    %c0_66 = arith.constant 0 : index
    %c0_67 = arith.constant 0 : index
    %c0_68 = arith.constant 0 : index
    %157 = vector.load %arg6[%c0_66, %c0_67, %c0_68] : memref<2x32x64xf32, #tpu.memory_space<vmem>>, vector<1x32x64xf32>
    %158 = vector.shape_cast %157 : vector<1x32x64xf32> to vector<32x64xf32>
    %cst_69 = arith.constant dense<0.000000e+00> : vector<8x64xf32>
    %159 = tpu.matmul %156, %158, %cst_69 {dimension_numbers = #tpu.dot_dimension_numbers<[1], [0], [0], [1], [0, 0, 1, 1], [], []>} : vector<8x32xf32>, vector<32x64xf32>, vector<8x64xf32> -> vector<8x64xf32>
    %160 = vector.broadcast %33 : vector<1x64xf32> to vector<8x64xf32>
    %161 = arith.addf %159, %160 : vector<8x64xf32>
    %cst_70 = arith.constant 5.000000e-01 : f32
    %162 = vector.broadcast %cst_70 : f32 to vector<8x64xf32>
    %163 = arith.mulf %162, %161 : vector<8x64xf32>
    %cst_71 = arith.constant 4.471500e-02 : f32
    %164 = vector.broadcast %cst_71 : f32 to vector<8x64xf32>
    %165 = arith.mulf %164, %161 : vector<8x64xf32>
    %166 = arith.mulf %165, %161 : vector<8x64xf32>
    %167 = arith.mulf %166, %161 : vector<8x64xf32>
    %168 = arith.addf %161, %167 : vector<8x64xf32>
    %cst_72 = arith.constant 0.797884583 : f32
    %169 = vector.broadcast %cst_72 : f32 to vector<8x64xf32>
    %170 = arith.mulf %169, %168 : vector<8x64xf32>
    %171 = math.tanh %170 : vector<8x64xf32>
    %cst_73 = arith.constant 1.000000e+00 : f32
    %172 = vector.broadcast %cst_73 : f32 to vector<8x64xf32>
    %173 = arith.addf %172, %171 : vector<8x64xf32>
    %174 = arith.mulf %163, %173 : vector<8x64xf32>
    %c0_74 = arith.constant 0 : index
    %c0_75 = arith.constant 0 : index
    %c0_76 = arith.constant 0 : index
    %175 = vector.load %arg7[%c0_74, %c0_75, %c0_76] : memref<2x64x32xf32, #tpu.memory_space<vmem>>, vector<1x64x32xf32>
    %176 = vector.shape_cast %175 : vector<1x64x32xf32> to vector<64x32xf32>
    %cst_77 = arith.constant dense<0.000000e+00> : vector<8x32xf32>
    %177 = tpu.matmul %174, %176, %cst_77 {dimension_numbers = #tpu.dot_dimension_numbers<[1], [0], [0], [1], [0, 0, 1, 1], [], []>} : vector<8x64xf32>, vector<64x32xf32>, vector<8x32xf32> -> vector<8x32xf32>
    %178 = vector.broadcast %41 : vector<1x32xf32> to vector<8x32xf32>
    %179 = arith.addf %177, %178 : vector<8x32xf32>
    %180 = arith.addf %156, %179 : vector<8x32xf32>
    %cst_78 = arith.constant dense<0.000000e+00> : vector<8xf32>
    %181 = vector.multi_reduction <add>, %180, %cst_78 [1] : vector<8x32xf32> to vector<8xf32>
    %182 = vector.shape_cast %181 : vector<8xf32> to vector<8x1xf32>
    %cst_79 = arith.constant 3.200000e+01 : f32
    %183 = vector.broadcast %cst_79 : f32 to vector<8x1xf32>
    %184 = arith.divf %182, %183 : vector<8x1xf32>
    %185 = vector.broadcast %184 : vector<8x1xf32> to vector<8x32xf32>
    %186 = arith.subf %180, %185 : vector<8x32xf32>
    %187 = arith.mulf %186, %186 : vector<8x32xf32>
    %cst_80 = arith.constant dense<0.000000e+00> : vector<8xf32>
    %188 = vector.multi_reduction <add>, %187, %cst_80 [1] : vector<8x32xf32> to vector<8xf32>
    %189 = vector.shape_cast %188 : vector<8xf32> to vector<8x1xf32>
    %cst_81 = arith.constant 3.200000e+01 : f32
    %190 = vector.broadcast %cst_81 : f32 to vector<8x1xf32>
    %191 = arith.divf %189, %190 : vector<8x1xf32>
    %192 = vector.broadcast %184 : vector<8x1xf32> to vector<8x32xf32>
    %193 = arith.subf %180, %192 : vector<8x32xf32>
    %cst_82 = arith.constant 9.99999996E-13 : f32
    %194 = vector.broadcast %cst_82 : f32 to vector<8x1xf32>
    %195 = arith.addf %191, %194 : vector<8x1xf32>
    %196 = math.rsqrt %195 : vector<8x1xf32>
    %197 = vector.broadcast %196 : vector<8x1xf32> to vector<8x32xf32>
    %198 = arith.mulf %193, %197 : vector<8x32xf32>
    %199 = vector.broadcast %43 : vector<1x32xf32> to vector<8x32xf32>
    %200 = arith.mulf %198, %199 : vector<8x32xf32>
    %201 = vector.broadcast %45 : vector<1x32xf32> to vector<8x32xf32>
    %202 = arith.addf %200, %201 : vector<8x32xf32>
    %c1_83 = arith.constant 1 : index
    %c0_84 = arith.constant 0 : index
    %c0_85 = arith.constant 0 : index
    %203 = vector.load %arg3[%c1_83, %c0_84, %c0_85] : memref<2x5x96xf32, #tpu.memory_space<vmem>>, vector<1x1x96xf32>
    %204 = vector.shape_cast %203 : vector<1x1x96xf32> to vector<1x96xf32>
    %c1_86 = arith.constant 1 : index
    %c1_87 = arith.constant 1 : index
    %c0_88 = arith.constant 0 : index
    %205 = vector.load %arg3[%c1_86, %c1_87, %c0_88] : memref<2x5x96xf32, #tpu.memory_space<vmem>>, vector<1x1x64xf32>
    %206 = vector.shape_cast %205 : vector<1x1x64xf32> to vector<1x64xf32>
    %c1_89 = arith.constant 1 : index
    %c2_90 = arith.constant 2 : index
    %c0_91 = arith.constant 0 : index
    %207 = vector.load %arg3[%c1_89, %c2_90, %c0_91] : memref<2x5x96xf32, #tpu.memory_space<vmem>>, vector<1x1x32xf32>
    %208 = vector.shape_cast %207 : vector<1x1x32xf32> to vector<1x32xf32>
    %c1_92 = arith.constant 1 : index
    %c2_93 = arith.constant 2 : index
    %c32_94 = arith.constant 32 : index
    %209 = vector.load %arg3[%c1_92, %c2_93, %c32_94] : memref<2x5x96xf32, #tpu.memory_space<vmem>>, vector<1x1x32xf32>
    %210 = vector.shape_cast %209 : vector<1x1x32xf32> to vector<1x32xf32>
    %c1_95 = arith.constant 1 : index
    %c2_96 = arith.constant 2 : index
    %c64_97 = arith.constant 64 : index
    %211 = vector.load %arg3[%c1_95, %c2_96, %c64_97] : memref<2x5x96xf32, #tpu.memory_space<vmem>>, vector<1x1x32xf32>
    %212 = vector.shape_cast %211 : vector<1x1x32xf32> to vector<1x32xf32>
    %c1_98 = arith.constant 1 : index
    %c3_99 = arith.constant 3 : index
    %c0_100 = arith.constant 0 : index
    %213 = vector.load %arg3[%c1_98, %c3_99, %c0_100] : memref<2x5x96xf32, #tpu.memory_space<vmem>>, vector<1x1x32xf32>
    %214 = vector.shape_cast %213 : vector<1x1x32xf32> to vector<1x32xf32>
    %c1_101 = arith.constant 1 : index
    %c3_102 = arith.constant 3 : index
    %c32_103 = arith.constant 32 : index
    %215 = vector.load %arg3[%c1_101, %c3_102, %c32_103] : memref<2x5x96xf32, #tpu.memory_space<vmem>>, vector<1x1x32xf32>
    %216 = vector.shape_cast %215 : vector<1x1x32xf32> to vector<1x32xf32>
    %c1_104 = arith.constant 1 : index
    %c3_105 = arith.constant 3 : index
    %c64_106 = arith.constant 64 : index
    %217 = vector.load %arg3[%c1_104, %c3_105, %c64_106] : memref<2x5x96xf32, #tpu.memory_space<vmem>>, vector<1x1x32xf32>
    %218 = vector.shape_cast %217 : vector<1x1x32xf32> to vector<1x32xf32>
    %c1_107 = arith.constant 1 : index
    %c0_108 = arith.constant 0 : index
    %c0_109 = arith.constant 0 : index
    %219 = vector.load %arg4[%c1_107, %c0_108, %c0_109] : memref<2x32x96xf32, #tpu.memory_space<vmem>>, vector<1x32x96xf32>
    %220 = vector.shape_cast %219 : vector<1x32x96xf32> to vector<32x96xf32>
    %cst_110 = arith.constant dense<0.000000e+00> : vector<8x96xf32>
    %221 = tpu.matmul %202, %220, %cst_110 {dimension_numbers = #tpu.dot_dimension_numbers<[1], [0], [0], [1], [0, 0, 1, 1], [], []>} : vector<8x32xf32>, vector<32x96xf32>, vector<8x96xf32> -> vector<8x96xf32>
    %222 = vector.broadcast %204 : vector<1x96xf32> to vector<8x96xf32>
    %223 = arith.addf %221, %222 : vector<8x96xf32>
    %224 = vector.extract_strided_slice %223 {offsets = [0, 0], sizes = [1, 32], strides = [1, 1]} : vector<8x96xf32> to vector<1x32xf32>
    %225 = vector.extract_strided_slice %202 {offsets = [0, 0], sizes = [1, 32], strides = [1, 1]} : vector<8x32xf32> to vector<1x32xf32>
    %226 = vector.extract_strided_slice %224 {offsets = [0, 0], sizes = [1, 8], strides = [1, 1]} : vector<1x32xf32> to vector<1x8xf32>
    %227 = vector.extract_strided_slice %223 {offsets = [0, 32], sizes = [8, 8], strides = [1, 1]} : vector<8x96xf32> to vector<8x8xf32>
    %228 = vector.extract_strided_slice %223 {offsets = [0, 64], sizes = [8, 8], strides = [1, 1]} : vector<8x96xf32> to vector<8x8xf32>
    %cst_111 = arith.constant dense<0.000000e+00> : vector<1x8xf32>
    %229 = tpu.matmul %226, %227, %cst_111 {dimension_numbers = #tpu.dot_dimension_numbers<[1], [1], [0], [0], [0, 0, 1, 0], [], []>} : vector<1x8xf32>, vector<8x8xf32>, vector<1x8xf32> -> vector<1x8xf32>
    %cst_112 = arith.constant 0.353553385 : f32
    %230 = vector.broadcast %cst_112 : f32 to vector<1x8xf32>
    %231 = arith.mulf %229, %230 : vector<1x8xf32>
    %232 = arith.addf %231, %1 : vector<1x8xf32>
    %cst_113 = arith.constant dense<0xFF800000> : vector<1xf32>
    %233 = vector.multi_reduction <maximumf>, %232, %cst_113 [1] : vector<1x8xf32> to vector<1xf32>
    %234 = vector.shape_cast %233 : vector<1xf32> to vector<1x1xf32>
    %235 = vector.broadcast %234 : vector<1x1xf32> to vector<1x8xf32>
    %236 = arith.subf %232, %235 : vector<1x8xf32>
    %237 = math.exp %236 : vector<1x8xf32>
    %cst_114 = arith.constant dense<0.000000e+00> : vector<1xf32>
    %238 = vector.multi_reduction <add>, %237, %cst_114 [1] : vector<1x8xf32> to vector<1xf32>
    %239 = vector.shape_cast %238 : vector<1xf32> to vector<1x1xf32>
    %240 = tpu.reciprocal %239 {approx = true} : vector<1x1xf32> -> vector<1x1xf32>
    %241 = vector.broadcast %240 : vector<1x1xf32> to vector<1x8xf32>
    %242 = arith.mulf %237, %241 : vector<1x8xf32>
    %cst_115 = arith.constant dense<0.000000e+00> : vector<1x8xf32>
    %243 = tpu.matmul %242, %228, %cst_115 {dimension_numbers = #tpu.dot_dimension_numbers<[1], [0], [0], [1], [0, 0, 1, 1], [], []>} : vector<1x8xf32>, vector<8x8xf32>, vector<1x8xf32> -> vector<1x8xf32>
    %244 = vector.extract_strided_slice %224 {offsets = [0, 8], sizes = [1, 8], strides = [1, 1]} : vector<1x32xf32> to vector<1x8xf32>
    %245 = vector.extract_strided_slice %223 {offsets = [0, 40], sizes = [8, 8], strides = [1, 1]} : vector<8x96xf32> to vector<8x8xf32>
    %246 = vector.extract_strided_slice %223 {offsets = [0, 72], sizes = [8, 8], strides = [1, 1]} : vector<8x96xf32> to vector<8x8xf32>
    %cst_116 = arith.constant dense<0.000000e+00> : vector<1x8xf32>
    %247 = tpu.matmul %244, %245, %cst_116 {dimension_numbers = #tpu.dot_dimension_numbers<[1], [1], [0], [0], [0, 0, 1, 0], [], []>} : vector<1x8xf32>, vector<8x8xf32>, vector<1x8xf32> -> vector<1x8xf32>
    %cst_117 = arith.constant 0.353553385 : f32
    %248 = vector.broadcast %cst_117 : f32 to vector<1x8xf32>
    %249 = arith.mulf %247, %248 : vector<1x8xf32>
    %250 = arith.addf %249, %1 : vector<1x8xf32>
    %cst_118 = arith.constant dense<0xFF800000> : vector<1xf32>
    %251 = vector.multi_reduction <maximumf>, %250, %cst_118 [1] : vector<1x8xf32> to vector<1xf32>
    %252 = vector.shape_cast %251 : vector<1xf32> to vector<1x1xf32>
    %253 = vector.broadcast %252 : vector<1x1xf32> to vector<1x8xf32>
    %254 = arith.subf %250, %253 : vector<1x8xf32>
    %255 = math.exp %254 : vector<1x8xf32>
    %cst_119 = arith.constant dense<0.000000e+00> : vector<1xf32>
    %256 = vector.multi_reduction <add>, %255, %cst_119 [1] : vector<1x8xf32> to vector<1xf32>
    %257 = vector.shape_cast %256 : vector<1xf32> to vector<1x1xf32>
    %258 = tpu.reciprocal %257 {approx = true} : vector<1x1xf32> -> vector<1x1xf32>
    %259 = vector.broadcast %258 : vector<1x1xf32> to vector<1x8xf32>
    %260 = arith.mulf %255, %259 : vector<1x8xf32>
    %cst_120 = arith.constant dense<0.000000e+00> : vector<1x8xf32>
    %261 = tpu.matmul %260, %246, %cst_120 {dimension_numbers = #tpu.dot_dimension_numbers<[1], [0], [0], [1], [0, 0, 1, 1], [], []>} : vector<1x8xf32>, vector<8x8xf32>, vector<1x8xf32> -> vector<1x8xf32>
    %262 = vector.extract_strided_slice %224 {offsets = [0, 16], sizes = [1, 8], strides = [1, 1]} : vector<1x32xf32> to vector<1x8xf32>
    %263 = vector.extract_strided_slice %223 {offsets = [0, 48], sizes = [8, 8], strides = [1, 1]} : vector<8x96xf32> to vector<8x8xf32>
    %264 = vector.extract_strided_slice %223 {offsets = [0, 80], sizes = [8, 8], strides = [1, 1]} : vector<8x96xf32> to vector<8x8xf32>
    %cst_121 = arith.constant dense<0.000000e+00> : vector<1x8xf32>
    %265 = tpu.matmul %262, %263, %cst_121 {dimension_numbers = #tpu.dot_dimension_numbers<[1], [1], [0], [0], [0, 0, 1, 0], [], []>} : vector<1x8xf32>, vector<8x8xf32>, vector<1x8xf32> -> vector<1x8xf32>
    %cst_122 = arith.constant 0.353553385 : f32
    %266 = vector.broadcast %cst_122 : f32 to vector<1x8xf32>
    %267 = arith.mulf %265, %266 : vector<1x8xf32>
    %268 = arith.addf %267, %1 : vector<1x8xf32>
    %cst_123 = arith.constant dense<0xFF800000> : vector<1xf32>
    %269 = vector.multi_reduction <maximumf>, %268, %cst_123 [1] : vector<1x8xf32> to vector<1xf32>
    %270 = vector.shape_cast %269 : vector<1xf32> to vector<1x1xf32>
    %271 = vector.broadcast %270 : vector<1x1xf32> to vector<1x8xf32>
    %272 = arith.subf %268, %271 : vector<1x8xf32>
    %273 = math.exp %272 : vector<1x8xf32>
    %cst_124 = arith.constant dense<0.000000e+00> : vector<1xf32>
    %274 = vector.multi_reduction <add>, %273, %cst_124 [1] : vector<1x8xf32> to vector<1xf32>
    %275 = vector.shape_cast %274 : vector<1xf32> to vector<1x1xf32>
    %276 = tpu.reciprocal %275 {approx = true} : vector<1x1xf32> -> vector<1x1xf32>
    %277 = vector.broadcast %276 : vector<1x1xf32> to vector<1x8xf32>
    %278 = arith.mulf %273, %277 : vector<1x8xf32>
    %cst_125 = arith.constant dense<0.000000e+00> : vector<1x8xf32>
    %279 = tpu.matmul %278, %264, %cst_125 {dimension_numbers = #tpu.dot_dimension_numbers<[1], [0], [0], [1], [0, 0, 1, 1], [], []>} : vector<1x8xf32>, vector<8x8xf32>, vector<1x8xf32> -> vector<1x8xf32>
    %280 = vector.extract_strided_slice %224 {offsets = [0, 24], sizes = [1, 8], strides = [1, 1]} : vector<1x32xf32> to vector<1x8xf32>
    %281 = vector.extract_strided_slice %223 {offsets = [0, 56], sizes = [8, 8], strides = [1, 1]} : vector<8x96xf32> to vector<8x8xf32>
    %282 = vector.extract_strided_slice %223 {offsets = [0, 88], sizes = [8, 8], strides = [1, 1]} : vector<8x96xf32> to vector<8x8xf32>
    %cst_126 = arith.constant dense<0.000000e+00> : vector<1x8xf32>
    %283 = tpu.matmul %280, %281, %cst_126 {dimension_numbers = #tpu.dot_dimension_numbers<[1], [1], [0], [0], [0, 0, 1, 0], [], []>} : vector<1x8xf32>, vector<8x8xf32>, vector<1x8xf32> -> vector<1x8xf32>
    %cst_127 = arith.constant 0.353553385 : f32
    %284 = vector.broadcast %cst_127 : f32 to vector<1x8xf32>
    %285 = arith.mulf %283, %284 : vector<1x8xf32>
    %286 = arith.addf %285, %1 : vector<1x8xf32>
    %cst_128 = arith.constant dense<0xFF800000> : vector<1xf32>
    %287 = vector.multi_reduction <maximumf>, %286, %cst_128 [1] : vector<1x8xf32> to vector<1xf32>
    %288 = vector.shape_cast %287 : vector<1xf32> to vector<1x1xf32>
    %289 = vector.broadcast %288 : vector<1x1xf32> to vector<1x8xf32>
    %290 = arith.subf %286, %289 : vector<1x8xf32>
    %291 = math.exp %290 : vector<1x8xf32>
    %cst_129 = arith.constant dense<0.000000e+00> : vector<1xf32>
    %292 = vector.multi_reduction <add>, %291, %cst_129 [1] : vector<1x8xf32> to vector<1xf32>
    %293 = vector.shape_cast %292 : vector<1xf32> to vector<1x1xf32>
    %294 = tpu.reciprocal %293 {approx = true} : vector<1x1xf32> -> vector<1x1xf32>
    %295 = vector.broadcast %294 : vector<1x1xf32> to vector<1x8xf32>
    %296 = arith.mulf %291, %295 : vector<1x8xf32>
    %cst_130 = arith.constant dense<0.000000e+00> : vector<1x8xf32>
    %297 = tpu.matmul %296, %282, %cst_130 {dimension_numbers = #tpu.dot_dimension_numbers<[1], [0], [0], [1], [0, 0, 1, 1], [], []>} : vector<1x8xf32>, vector<8x8xf32>, vector<1x8xf32> -> vector<1x8xf32>
    %298 = tpu.concatenate %243, %261, %279, %297 in 1 : vector<1x8xf32>, vector<1x8xf32>, vector<1x8xf32>, vector<1x8xf32> -> vector<1x32xf32>
    %c1_131 = arith.constant 1 : index
    %c0_132 = arith.constant 0 : index
    %c0_133 = arith.constant 0 : index
    %299 = vector.load %arg5[%c1_131, %c0_132, %c0_133] : memref<2x32x32xf32, #tpu.memory_space<vmem>>, vector<1x32x32xf32>
    %300 = vector.shape_cast %299 : vector<1x32x32xf32> to vector<32x32xf32>
    %cst_134 = arith.constant dense<0.000000e+00> : vector<1x32xf32>
    %301 = tpu.matmul %298, %300, %cst_134 {dimension_numbers = #tpu.dot_dimension_numbers<[1], [0], [0], [1], [0, 0, 1, 1], [], []>} : vector<1x32xf32>, vector<32x32xf32>, vector<1x32xf32> -> vector<1x32xf32>
    %302 = arith.addf %301, %208 : vector<1x32xf32>
    %303 = arith.addf %225, %302 : vector<1x32xf32>
    %cst_135 = arith.constant dense<0.000000e+00> : vector<1xf32>
    %304 = vector.multi_reduction <add>, %303, %cst_135 [1] : vector<1x32xf32> to vector<1xf32>
    %305 = vector.shape_cast %304 : vector<1xf32> to vector<1x1xf32>
    %cst_136 = arith.constant 3.200000e+01 : f32
    %306 = vector.broadcast %cst_136 : f32 to vector<1x1xf32>
    %307 = arith.divf %305, %306 : vector<1x1xf32>
    %308 = vector.broadcast %307 : vector<1x1xf32> to vector<1x32xf32>
    %309 = arith.subf %303, %308 : vector<1x32xf32>
    %310 = arith.mulf %309, %309 : vector<1x32xf32>
    %cst_137 = arith.constant dense<0.000000e+00> : vector<1xf32>
    %311 = vector.multi_reduction <add>, %310, %cst_137 [1] : vector<1x32xf32> to vector<1xf32>
    %312 = vector.shape_cast %311 : vector<1xf32> to vector<1x1xf32>
    %cst_138 = arith.constant 3.200000e+01 : f32
    %313 = vector.broadcast %cst_138 : f32 to vector<1x1xf32>
    %314 = arith.divf %312, %313 : vector<1x1xf32>
    %315 = vector.broadcast %307 : vector<1x1xf32> to vector<1x32xf32>
    %316 = arith.subf %303, %315 : vector<1x32xf32>
    %cst_139 = arith.constant 9.99999996E-13 : f32
    %317 = vector.broadcast %cst_139 : f32 to vector<1x1xf32>
    %318 = arith.addf %314, %317 : vector<1x1xf32>
    %319 = math.rsqrt %318 : vector<1x1xf32>
    %320 = vector.broadcast %319 : vector<1x1xf32> to vector<1x32xf32>
    %321 = arith.mulf %316, %320 : vector<1x32xf32>
    %322 = arith.mulf %321, %210 : vector<1x32xf32>
    %323 = arith.addf %322, %212 : vector<1x32xf32>
    %c1_140 = arith.constant 1 : index
    %c0_141 = arith.constant 0 : index
    %c0_142 = arith.constant 0 : index
    %324 = vector.load %arg6[%c1_140, %c0_141, %c0_142] : memref<2x32x64xf32, #tpu.memory_space<vmem>>, vector<1x32x64xf32>
    %325 = vector.shape_cast %324 : vector<1x32x64xf32> to vector<32x64xf32>
    %cst_143 = arith.constant dense<0.000000e+00> : vector<1x64xf32>
    %326 = tpu.matmul %323, %325, %cst_143 {dimension_numbers = #tpu.dot_dimension_numbers<[1], [0], [0], [1], [0, 0, 1, 1], [], []>} : vector<1x32xf32>, vector<32x64xf32>, vector<1x64xf32> -> vector<1x64xf32>
    %327 = arith.addf %326, %206 : vector<1x64xf32>
    %cst_144 = arith.constant 5.000000e-01 : f32
    %328 = vector.broadcast %cst_144 : f32 to vector<1x64xf32>
    %329 = arith.mulf %328, %327 : vector<1x64xf32>
    %cst_145 = arith.constant 4.471500e-02 : f32
    %330 = vector.broadcast %cst_145 : f32 to vector<1x64xf32>
    %331 = arith.mulf %330, %327 : vector<1x64xf32>
    %332 = arith.mulf %331, %327 : vector<1x64xf32>
    %333 = arith.mulf %332, %327 : vector<1x64xf32>
    %334 = arith.addf %327, %333 : vector<1x64xf32>
    %cst_146 = arith.constant 0.797884583 : f32
    %335 = vector.broadcast %cst_146 : f32 to vector<1x64xf32>
    %336 = arith.mulf %335, %334 : vector<1x64xf32>
    %337 = math.tanh %336 : vector<1x64xf32>
    %cst_147 = arith.constant 1.000000e+00 : f32
    %338 = vector.broadcast %cst_147 : f32 to vector<1x64xf32>
    %339 = arith.addf %338, %337 : vector<1x64xf32>
    %340 = arith.mulf %329, %339 : vector<1x64xf32>
    %c1_148 = arith.constant 1 : index
    %c0_149 = arith.constant 0 : index
    %c0_150 = arith.constant 0 : index
    %341 = vector.load %arg7[%c1_148, %c0_149, %c0_150] : memref<2x64x32xf32, #tpu.memory_space<vmem>>, vector<1x64x32xf32>
    %342 = vector.shape_cast %341 : vector<1x64x32xf32> to vector<64x32xf32>
    %cst_151 = arith.constant dense<0.000000e+00> : vector<1x32xf32>
    %343 = tpu.matmul %340, %342, %cst_151 {dimension_numbers = #tpu.dot_dimension_numbers<[1], [0], [0], [1], [0, 0, 1, 1], [], []>} : vector<1x64xf32>, vector<64x32xf32>, vector<1x32xf32> -> vector<1x32xf32>
    %344 = arith.addf %343, %214 : vector<1x32xf32>
    %345 = arith.addf %323, %344 : vector<1x32xf32>
    %cst_152 = arith.constant dense<0.000000e+00> : vector<1xf32>
    %346 = vector.multi_reduction <add>, %345, %cst_152 [1] : vector<1x32xf32> to vector<1xf32>
    %347 = vector.shape_cast %346 : vector<1xf32> to vector<1x1xf32>
    %cst_153 = arith.constant 3.200000e+01 : f32
    %348 = vector.broadcast %cst_153 : f32 to vector<1x1xf32>
    %349 = arith.divf %347, %348 : vector<1x1xf32>
    %350 = vector.broadcast %349 : vector<1x1xf32> to vector<1x32xf32>
    %351 = arith.subf %345, %350 : vector<1x32xf32>
    %352 = arith.mulf %351, %351 : vector<1x32xf32>
    %cst_154 = arith.constant dense<0.000000e+00> : vector<1xf32>
    %353 = vector.multi_reduction <add>, %352, %cst_154 [1] : vector<1x32xf32> to vector<1xf32>
    %354 = vector.shape_cast %353 : vector<1xf32> to vector<1x1xf32>
    %cst_155 = arith.constant 3.200000e+01 : f32
    %355 = vector.broadcast %cst_155 : f32 to vector<1x1xf32>
    %356 = arith.divf %354, %355 : vector<1x1xf32>
    %357 = vector.broadcast %349 : vector<1x1xf32> to vector<1x32xf32>
    %358 = arith.subf %345, %357 : vector<1x32xf32>
    %cst_156 = arith.constant 9.99999996E-13 : f32
    %359 = vector.broadcast %cst_156 : f32 to vector<1x1xf32>
    %360 = arith.addf %356, %359 : vector<1x1xf32>
    %361 = math.rsqrt %360 : vector<1x1xf32>
    %362 = vector.broadcast %361 : vector<1x1xf32> to vector<1x32xf32>
    %363 = arith.mulf %358, %362 : vector<1x32xf32>
    %364 = arith.mulf %363, %216 : vector<1x32xf32>
    %365 = arith.addf %364, %218 : vector<1x32xf32>
    %c0_157 = arith.constant 0 : index
    %c0_158 = arith.constant 0 : index
    %c0_159 = arith.constant 0 : index
    %366 = vector.load %arg8[%c0_157, %c0_158, %c0_159] : memref<1x1x32xf32, #tpu.memory_space<vmem>>, vector<1x1x32xf32>
    %367 = vector.shape_cast %366 : vector<1x1x32xf32> to vector<1x32xf32>
    %368 = vector.shape_cast %365 : vector<1x32xf32> to vector<1x1x32xf32>
    tpu.vector_store %arg8[%c0_157, %c0_158, %c0_159], %368 {strides = array<i32>} : memref<1x1x32xf32, #tpu.memory_space<vmem>>, vector<1x1x32xf32>,
    return
  }
  func.func @transform_0(%arg0: i32) -> (i32, i32, i32) {
    %c0_i32 = arith.constant 0 : i32
    %c0_i32_0 = arith.constant 0 : i32
    %c0_i32_1 = arith.constant 0 : i32
    return %arg0, %c0_i32, %c0_i32_0 : i32, i32, i32
  }
  func.func @transform_1(%arg0: i32) -> (i32, i32, i32) {
    %c0_i32 = arith.constant 0 : i32
    %c0_i32_0 = arith.constant 0 : i32
    %c0_i32_1 = arith.constant 0 : i32
    return %arg0, %c0_i32, %c0_i32_0 : i32, i32, i32
  }
  func.func @transform_2(%arg0: i32) -> (i32, i32, i32) {
    %c0_i32 = arith.constant 0 : i32
    %c0_i32_0 = arith.constant 0 : i32
    %c0_i32_1 = arith.constant 0 : i32
    %c0_i32_2 = arith.constant 0 : i32
    return %c0_i32, %c0_i32_0, %c0_i32_1 : i32, i32, i32
  }
  func.func @transform_3(%arg0: i32) -> (i32, i32, i32) {
    %c0_i32 = arith.constant 0 : i32
    %c0_i32_0 = arith.constant 0 : i32
    %c0_i32_1 = arith.constant 0 : i32
    %c0_i32_2 = arith.constant 0 : i32
    return %c0_i32, %c0_i32_0, %c0_i32_1 : i32, i32, i32
  }
  func.func @transform_4(%arg0: i32) -> (i32, i32, i32) {
    %c0_i32 = arith.constant 0 : i32
    %c0_i32_0 = arith.constant 0 : i32
    %c0_i32_1 = arith.constant 0 : i32
    %c0_i32_2 = arith.constant 0 : i32
    return %c0_i32, %c0_i32_0, %c0_i32_1 : i32, i32, i32
  }
  func.func @transform_5(%arg0: i32) -> (i32, i32, i32) {
    %c0_i32 = arith.constant 0 : i32
    %c0_i32_0 = arith.constant 0 : i32
    %c0_i32_1 = arith.constant 0 : i32
    %c0_i32_2 = arith.constant 0 : i32
    return %c0_i32, %c0_i32_0, %c0_i32_1 : i32, i32, i32
  }
  func.func @transform_6(%arg0: i32) -> (i32, i32, i32) {
    %c0_i32 = arith.constant 0 : i32
    %c0_i32_0 = arith.constant 0 : i32
    %c0_i32_1 = arith.constant 0 : i32
    %c0_i32_2 = arith.constant 0 : i32
    return %c0_i32, %c0_i32_0, %c0_i32_1 : i32, i32, i32
  }
  func.func @transform_7(%arg0: i32) -> (i32, i32, i32) {
    %c0_i32 = arith.constant 0 : i32
    %c0_i32_0 = arith.constant 0 : i32
    %c0_i32_1 = arith.constant 0 : i32
    return %arg0, %c0_i32, %c0_i32_0 : i32, i32, i32
  }
}

</mosaic_0001>

<bundles_post_ra>
// kernel: tpu_custom_call.1
= control target key start
LH: loop header
LB: loop body
LE: loop exit
PB: predicated region body
PF: predicated region fallthrough
CT: control target
= control target key end

     0   :  { %12 = vsyncpa [#allocation3], 0  ;;  %s3637_s0 = inlined_call_operand.vmem [shape: f32[2,8,32], index: 0, kind: input, shape index: {}]   ;;  %s3638_s1 = inlined_call_operand.vmem [shape: f32[2,1,8], index: 1, kind: input, shape index: {}]   ;;  %s3639_s2 = inlined_call_operand.vmem [shape: f32[2,5,96], index: 2, kind: input, shape index: {}]   ;;  %s3640_s3 = inlined_call_operand.vmem [shape: f32[2,32,96], index: 3, kind: input, shape index: {}]   ;;  %s3641_s4 = inlined_call_operand.vmem [shape: f32[2,32,32], index: 4, kind: input, shape index: {}]   ;;  %s3642_s5 = inlined_call_operand.vmem [shape: f32[2,32,64], index: 5, kind: input, shape index: {}]   ;;  %s3643_s6 = inlined_call_operand.vmem [shape: f32[2,64,32], index: 6, kind: input, shape index: {}]   ;;  %s3644_s7 = inlined_call_operand.hbm [shape: f32[2,1,32], index: 7, kind: output, shape index: {}]  }
   0x1   :  { %14 = vsyncpa [#allocation3 + $0x1], 0  ;;  %s3154_s24 = smov 0   ;;  %s3156_s25 = smov 0  }
   0x2   :  { %s3158_s26 = smov 0   ;;  %s3160_s27 = smov 0  }
   0x3 LB: > { %s3175_s28 = sadd.s32 4294967295, %s3094_s27   ;;  %s2536_s29 = sadd.s32 4294967294, %s3094_s27   ;;  %s3094_s27 = sphi %s3160_s27, %s3668_s27   ;;  %s3090_s26 = sphi %s3158_s26, %s3667_s26   ;;  %s3086_s25 = sphi %s3156_s25, %s3666_s25   ;;  %s3082_s24 = sphi %s3154_s24, %s3665_s24  }
   0x4   : > { %s3179_s30 = sadd.s32 1, %s3094_s27   ;;  %s184_s8 = sadd.s32 1, %s3090_s26 }
   0x5   : > { %s181_s9 = ssub.s32 %s3094_s27, %s3179_s30  ;;  %p194_p0 = scmp.ne.s32.totalorder %s3090_s26, %s3086_s25 }
   0x6   : > { %p182_p1 = scmp.eq.s32.totalorder %s181_s9, 0  ;;  %p195_p2 = scmp.eq.s32.totalorder %s3175_s28, 1 }
   0x7   : > { %p200_p3 = scmp.ne.s32.totalorder %s3086_s25, %s3082_s24  ;;  %p201_p4 = scmp.eq.s32.totalorder %s2536_s29, 1 }
   0x8   : > { %s3190_s10 = scalar_select %p182_p1, %s3090_s26, %s184_s8  }
   0x9   : > { %p3192_p5 = por %p195_p2, %p194_p0  ;;  %p3196_p6 = por %p201_p4, %p200_p3 }
   0xa   : > { %p2539_p7 = scmp.ge.s32.totalorder %s3094_s27, 1  ;;  %p247_p8 = scmp.lt.s32.totalorder %s3094_s27, 3 }
   0xc   : > { %p248_p9 = pnand %p2539_p7, %p247_p8 }
   0xd   : > { %p280_p10 = scmp.lt.s32.totalorder (!%p248_p9), %s3175_s28, 1  ;;  %vm290_vm0 = vcmask (!%p248_p9), 261120   ;;  %v2541_v2 = vld [vmem:[%s3639_s2 + $0x4] ss:$0 sm:$0xff] (!%p248_p9)  ;;  %s3096_s20 = smov (!%p248_p9), 96   ;;  %v320_v9 = vld [vmem:[%s3640_s3 + $0x8] sm:$0xff] (!%p248_p9)  ;;  %v480_v35 = vlaneseq (!%p248_p9) }
   0xe   : > { %251 = sbr.rel (%p248_p9) target bundleno = 5441 (0x1541), region = 48  ;;  %311 = vrot.lane.b32.xlu1 (!%p248_p9), %v2541_v2, %s3096_s20  ;;  %v319_v8 = vld [vmem:[%s3640_s3] sm:$0xff] (!%p248_p9)  ;;  %v321_v10 = vld [vmem:[%s3640_s3 + $0x10] sm:$0xff] (!%p248_p9)  ;;  %v3097_v11 = vmov (!%p248_p9), 0.0|0.0   ;;  %v322_v13 = vld [vmem:[%s3640_s3 + $0x18] sm:$0xff] (!%p248_p9)  ;;  %vm3098_vm1 = vmmov (!%p248_p9), 0  }
   0xf   : > { %2870 = vmatprep.subr.bf16.mxu1 (!%p248_p9), %v3097_v11  ;;  %v2871_v12 = vpack.c.bf16 (!%p248_p9), %v320_v9, %v319_v8  ;;  %v2874_v14 = vpack.c.bf16 (!%p248_p9), %v322_v13, %v321_v10  ;;  %v3099_v15 = vmov (!%p248_p9), 0.0   ;;  %v2542_v24 = vld [vmem:[%s3639_s2] ss:$0 sm:$0xff] (!%p248_p9)  ;;  %s3100_s18 = smov (!%p248_p9), 88   ;;  %s3101_s19 = smov (!%p248_p9), 120   ;;  %vm403_vm2 = vcmask (!%p248_p9), 64512  }
  0x10   : > { %2694 = vmatprep.mubr.msk.f32.mxu1 (!%p248_p9), %vm3098_vm1, %v3099_v15  ;;  %2707 = vmatprep.subr.mxu0 (!%p248_p9), %v3099_v15  ;;  %s3102_s21 = smov (!%p248_p9), 80   ;;  %s3652_s22 = smov (!%p248_p9), 112   ;;  %v481_v36 = vshrl.u32 (!%p248_p9), %v480_v35, 7  ;;  %v1091_v35 = vld [vmem:[%s3641_s4] sm:$0xff] (!%p248_p9)  ;;  %vm1087_vm3 = vcmask (!%p248_p9), 130048   ;;  %vm1089_vm4 = vcmask (!%p248_p9), 195584  }
  0x11   : > { %2872 = vmatpush3.bf16.msra.mxu1 (!%p248_p9), %v2871_v12  ;;  %2709 = vmatprep.mubr.msk.f32.mxu0 (!%p248_p9), %vm3098_vm1, %v3099_v15  ;;  %s3653_s23 = smov (!%p248_p9), 72   ;;  %s3648_s29 = smov (!%p248_p9), 104   ;;  %vm1297_vm5 = vcmask (!%p248_p9), 523264   ;;  %vm1560_vm6 = vcmask (!%p248_p9), 57344   ;;  %vm2243_vm7 = vcmask (!%p248_p9), 253952  }
  0x12   : > { %2873 = vmatprep.subr.bf16.mxu1 (!%p248_p9), %v3097_v11  ;;  %v482_v37 = vsub.s32 (!%p248_p9), 0, %v481_v36  ;;  %s3107_s15 = smov (!%p248_p9), 64   ;;  %s3646_s16 = smov (!%p248_p9), 48   ;;  %v1092_v36 = vld [vmem:[%s3641_s4 + $0x8] sm:$0xff] (!%p248_p9) }
  0x13   : > { %s3657_s8 = smov (!%p248_p9), 112   ;;  %s3658_s9 = smov (!%p248_p9), 104  }
  0x15   : > { %s3204_s13 = scalar_select %p280_p10, %s3175_s28, 1  ;;  %2875 = vmatpush3.bf16.msra.mxu1 %v2874_v14 }
  0x16   : > { %2697 = vmatprep.subr.mxu1 %v3099_v15 }
  0x17   : > { %s2540_s14 = sshll.u32 %s3204_s13, 3 }
  0x18   : > { %s283_s17 = scalar_lea.vmem %s3637_s0, %s2540_s14  ;;  %s286_s14 = scalar_lea.vmem %s3638_s1, %s3204_s13 }
  0x19   : > { %v289_v0 = vld [vmem:[%s283_s17] sm:$0xff]  ;;  %s3647_s13 = smov 56   ;;  %s3645_s17 = smov 40  }
  0x1a   : > { %v291_v1 = vsel %vm290_vm0, %v289_v0, 0.0  ;;  %v3286_v38 = vld [vmem:[%s286_s14] sm:$0x1]  ;;  %s3649_s14 = smov 24  }
  0x1b   : > { %292 = vadd.xlane.f32.xlu0 %v291_v1  ;;  %v483_v39 = vrot.slane %v3286_v38, %v482_v37  ;;  %v2877_v37 = vpack.c.bf16 %v1092_v36, %v1091_v35 }
  0x80   : > { %v312_v21 = vpop.permute.xlu1 %311 }
  0xa8   : > { %v293_v3 = vpop.xlane.xlu0 %292 }
  0xa9   : > { %v295_v4 = vmul.f32 0.03125, %v293_v3 }
  0xab   : > { %v296_v5 = vsub.f32 %v289_v0, %v295_v4 }
  0xad   : > { %v297_v6 = vmul.f32 %v296_v5, %v296_v5 }
  0xaf   : > { %v298_v7 = vsel %vm290_vm0, %v297_v6, 0.0 }
  0xb0   : > { %299 = vadd.xlane.f32.xlu0 %v298_v7 }
 0x13d   : > { %v300_v16 = vpop.xlane.xlu0 %299 }
 0x13e   : > { %v301_v17 = vmul.f32 0.03125, %v300_v16 }
 0x140   : > { %v302_v18 = vadd.f32 1e-12, %v301_v17 }
 0x142   : > { %2986 = vrsqrt.f32 %v302_v18 }
 0x14c   : > { %v2987_v19 = vpop.eup %2986 }
 0x14d   : > { %v304_v20 = vmul.f32 %v2987_v19, %v296_v5 }
 0x14f   : > { %v309_v22 = vmul.f32 %v2541_v2, %v304_v20 }
 0x151   : > { %v3236_v23 = vadd.f32 %v312_v21, %v309_v22 }
 0x153   : > { %2695 = vmatmul.mubr.msk.f32.vlgmr.msra.gmra.mrb[0].mxu1 %vm290_vm0, %v3236_v23 }
 0x154   : > { %2699 = vmatprep.mubr.msk.f32.mxu1 %vm3098_vm1, %v3099_v15 }
 0x226   : > { %v396_v25 = vpop.f32.mrb[0].mxu1 }
 0x227   : > { %v3245_v26 = vadd.f32 %v2542_v24, %v396_v25  ;;  %v2696_v27 = vpop.f32.mrb[1].mxu1 }
 0x229   : > { %575 = vrot.lane.b32.xlu0 %v3245_v26, %s3100_s18  ;;  %401 = vrot.lane.b32.xlu1 %v3245_v26, %s3096_s20 }
 0x22d   : > { %573 = vrot.lane.b32.xlu1 %v3245_v26, %s3101_s19 }
 0x231   : > { %742 = vrot.lane.b32.xlu1 %v3245_v26, %s3102_s21 }
 0x235   : > { %740 = vrot.lane.b32.xlu1 %v3245_v26, %s3652_s22 }
 0x239   : > { %909 = vrot.lane.b32.xlu1 %v3245_v26, %s3653_s23 }
 0x23d   : > { %907 = vrot.lane.b32.xlu1 %v3245_v26, %s3648_s29 }
 0x29b   : > { %v576_v28 = vpop.permute.xlu0 %575  ;;  %v402_v29 = vpop.permute.xlu1 %401 }
 0x29c   : > { %2698 = vmatpush3.xpose.msk.msra.mxu1 %vm403_vm2, %v402_v29  ;;  %2708 = vmatpush3.xpose.msk.msra.mxu0 %vm403_vm2, %v576_v28 }
 0x29d   : > { %2717 = vmatprep.subr.mxu0 %v3099_v15  ;;  %2702 = vmatprep.subr.mxu1 %v3099_v15 }
 0x29f   : > { %2700 = vmatmul.mubr.msk.f32.vlgmr.msra.gmra.mrb[2].mxu1 %vm403_vm2, %v3245_v26  ;;  %v574_v30 = vpop.permute.xlu1 %573 }
 0x2a0   : > { %2710 = vmatmul.mubr.msk.f32.vlgmr.msra.gmra.mrb[0].mxu0 %vm403_vm2, %v574_v30  ;;  %2704 = vmatprep.mubr.msk.f32.mxu1 %vm3098_vm1, %v3099_v15 }
 0x2a1   : > { %2719 = vmatprep.mubr.msk.f32.mxu0 %vm3098_vm1, %v3099_v15 }
 0x2a3   : > { %v743_v31 = vpop.permute.xlu1 %742 }
 0x2a4   : > { %2718 = vmatpush3.xpose.msk.msra.mxu0 %vm403_vm2, %v743_v31 }
 0x2a5   : > { %2727 = vmatprep.subr.mxu0 %v3099_v15 }
 0x2a7   : > { %v741_v32 = vpop.permute.xlu1 %740 }
 0x2a8   : > { %2720 = vmatmul.mubr.msk.f32.vlgmr.msra.gmra.mrb[2].mxu0 %vm403_vm2, %v741_v32 }
 0x2a9   : > { %2729 = vmatprep.mubr.msk.f32.mxu0 %vm3098_vm1, %v3099_v15 }
 0x2ab   : > { %v910_v33 = vpop.permute.xlu1 %909 }
 0x2ac   : > { %2728 = vmatpush3.xpose.msk.msra.mxu0 %vm403_vm2, %v910_v33 }
 0x2ad   : > { %2876 = vmatprep.subr.bf16.mxu0 %v3097_v11 }
 0x2af   : > { %v908_v34 = vpop.permute.xlu1 %907 }
 0x2b0   : > { %2730 = vmatmul.mubr.msk.f32.vlgmr.msra.gmra.mrb[4].mxu0 %vm403_vm2, %v908_v34 }
 0x2b1   : > { %2745 = vmatprep.mubr.msk.f32.mxu0 %vm3098_vm1, %v3099_v15  ;;  %2878 = vmatpush3.bf16.msra.mxu0 %v2877_v37 }
 0x2b2   : > { %2879 = vmatprep.subr.bf16.mxu0 %v3097_v11 }
 0x372   : > { %v474_v40 = vpop.f32.mrb[2].mxu1 }
 0x373   : > { %v478_v41 = vmul.f32 0.35355338, %v474_v40  ;;  %v2701_v42 = vpop.f32.mrb[3].mxu1  ;;  %v647_v43 = vpop.f32.mrb[0].mxu0 }
 0x374   : > { %v651_v44 = vmul.f32 0.35355338, %v647_v43  ;;  %v2711_v45 = vpop.f32.mrb[1].mxu0  ;;  %v1093_v43 = vld [vmem:[%s3641_s4 + $0x10] sm:$0xff] }
 0x375   : > { %v485_v46 = vadd.f32 %v483_v39, %v478_v41 }
 0x376   : > { %v652_v47 = vadd.f32 %v651_v44, %v483_v39  ;;  %v1094_v44 = vld [vmem:[%s3641_s4 + $0x18] sm:$0xff] }
 0x377   : > { %v486_v48 = vsel %vm403_vm2, %v485_v46, -inf  ;;  %v2880_v45 = vpack.c.bf16 %v1094_v44, %v1093_v43 }
 0x378   : > { %487 = vmax.xlane.f32.xlu1 %v486_v48  ;;  %v653_v49 = vsel %vm403_vm2, %v652_v47, -inf }
 0x379   : > { %654 = vmax.xlane.f32.xlu0 %v653_v49  ;;  %2881 = vmatpush3.bf16.msra.mxu0 %v2880_v45 }
 0x37a   : > { %2888 = vmatprep.subr.bf16.mxu0 %v3097_v11 }
 0x37b   : > { %v814_v50 = vpop.f32.mrb[2].mxu0 }
 0x37c   : > { %v818_v51 = vmul.f32 0.35355338, %v814_v50  ;;  %v2721_v52 = vpop.f32.mrb[3].mxu0 }
 0x37e   : > { %v819_v53 = vadd.f32 %v818_v51, %v483_v39 }
 0x380   : > { %v820_v54 = vsel %vm403_vm2, %v819_v53, -inf }
 0x381   : > { %821 = vmax.xlane.f32.xlu0 %v820_v54 }
 0x383   : > { %v981_v55 = vpop.f32.mrb[4].mxu0 }
 0x384   : > { %v985_v56 = vmul.f32 0.35355338, %v981_v55  ;;  %v2731_v57 = vpop.f32.mrb[5].mxu0 }
 0x386   : > { %v986_v58 = vadd.f32 %v985_v56, %v483_v39  ;;  %v2556_v56 = vld [vmem:[%s3639_s2 + $0x2] ss:$0 sm:$0xff] }
 0x388   : > { %v987_v59 = vsel %vm403_vm2, %v986_v58, -inf }
 0x389   : > { %988 = vmax.xlane.f32.xlu1 %v987_v59 }
 0x39a   : > { %664 = vrot.lane.b32.xlu1 %v3245_v26, %s3647_s13 }
 0x405   : > { %v488_v60 = vpop.xlane.xlu1 %487 }
 0x406   : > { %v489_v61 = vsub.f32 %v485_v46, %v488_v60  ;;  %v655_v62 = vpop.xlane.xlu0 %654 }
 0x407   : > { %v656_v63 = vsub.f32 %v652_v47, %v655_v62 }
 0x408   : > { %v490_v0 = vmul.f32 1.442695, %v489_v61 }
 0x409   : > { %v657_v1 = vmul.f32 1.442695, %v656_v63 }
 0x40a   : > { %2988 = vpow2.f32 %v490_v0 }
 0x40b   : > { %2990 = vpow2.f32 %v657_v1 }
 0x40e   : > { %v822_v12 = vpop.xlane.xlu0 %821 }
 0x40f   : > { %v823_v13 = vsub.f32 %v819_v53, %v822_v12 }
 0x411   : > { %v824_v14 = vmul.f32 1.442695, %v823_v13 }
 0x414   : > { %v2989_v2 = vpop.eup %2988 }
 0x415   : > { %v2991_v3 = vpop.eup %2990  ;;  %v492_v4 = vsel %vm403_vm2, %v2989_v2, 0.0 }
 0x416   : > { %493 = vadd.xlane.f32.xlu0 %v492_v4  ;;  %v989_v5 = vpop.xlane.xlu1 %988  ;;  %v659_v6 = vsel %vm403_vm2, %v2991_v3, 0.0 }
 0x417   : > { %v990_v7 = vsub.f32 %v986_v58, %v989_v5  ;;  %660 = vadd.xlane.f32.xlu1 %v659_v6  ;;  %v1197_v5 = vld [vmem:[%s3642_s5 + $0x10] sm:$0xff]  ;;  %v1198_v6 = vld [vmem:[%s3642_s5 + $0x18] sm:$0xff] }
 0x419   : > { %v991_v8 = vmul.f32 1.442695, %v990_v7  ;;  %v2886_v7 = vpack.c.bf16 %v1198_v6, %v1197_v5 }
 0x41a   : > { %v665_v18 = vpop.permute.xlu1 %664 }
 0x41b   : > { %2992 = vpow2.f32 %v991_v8 }
 0x41c   : > { %2994 = vpow2.f32 %v824_v14 }
 0x425   : > { %v2993_v9 = vpop.eup %2992 }
 0x426   : > { %v993_v10 = vsel %vm403_vm2, %v2993_v9, 0.0  ;;  %v2995_v16 = vpop.eup %2994 }
 0x427   : > { %994 = vadd.xlane.f32.xlu1 %v993_v10  ;;  %v826_v17 = vsel %vm403_vm2, %v2995_v16, 0.0 }
 0x42c   : > { %497 = vrot.lane.b32.xlu0 %v3245_v26, %s3107_s15 }
 0x438   : > { %831 = vrot.lane.b32.xlu1 %v3245_v26, %s3646_s16  ;;  %s3651_s16 = smov 8  }
 0x44b   : > { %827 = vadd.xlane.f32.xlu0 %v826_v17 }
 0x461   : > { %998 = vrot.lane.b32.xlu0 %v3245_v26, %s3645_s17  ;;  %s3650_s17 = smov 16  }
 0x4a3   : > { %v494_v19 = vpop.xlane.xlu0 %493 }
 0x4a4   : > { %2996 = vrcp.f32 %v494_v19  ;;  %v661_v20 = vpop.xlane.xlu1 %660  ;;  %v1285_v19 = vld [vmem:[%s3643_s6] sm:$0xff] }
 0x4a5   : > { %2998 = vrcp.f32 %v661_v20  ;;  %v1286_v20 = vld [vmem:[%s3643_s6 + $0x8] sm:$0xff] }
 0x4a7   : > { %v498_v21 = vpop.permute.xlu0 %497 }
 0x4a8   : > { %2703 = vmatpush3.msra.mxu1 %v498_v21  ;;  %v2889_v21 = vpack.c.bf16 %v1286_v20, %v1285_v19 }
 0x4a9   : > { %2712 = vmatprep.subr.mxu1 %v3099_v15 }
 0x4ae   : > { %v2997_v22 = vpop.eup %2996 }
 0x4af   : > { %v496_v24 = vmul.f32 %v2997_v22, %v2989_v2  ;;  %v2999_v25 = vpop.eup %2998  ;;  %v1287_v22 = vld [vmem:[%s3643_s6 + $0x10] sm:$0xff] }
 0x4b0   : > { %v663_v27 = vmul.f32 %v2999_v25, %v2991_v3  ;;  %v1195_v3 = vld [vmem:[%s3642_s5] sm:$0xff] }
 0x4b1   : > { %2705 = vmatmul.mubr.msk.f32.vlgmr.msra.gmra.mrb[4].mxu1 %vm403_vm2, %v496_v24  ;;  %v1288_v24 = vld [vmem:[%s3643_s6 + $0x18] sm:$0xff] }
 0x4b2   : > { %2713 = vmatpush3.msra.mxu1 %v665_v18  ;;  %2714 = vmatprep.mubr.msk.f32.mxu1 %vm3098_vm1, %v3099_v15  ;;  %v2892_v25 = vpack.c.bf16 %v1288_v24, %v1287_v22 }
 0x4b3   : > { %2722 = vmatprep.subr.mxu1 %v3099_v15 }
 0x4b4   : > { %v995_v26 = vpop.xlane.xlu1 %994 }
 0x4b5   : > { %2715 = vmatmul.mubr.msk.f32.vlgmr.msra.gmra.mrb[6].mxu1 %vm403_vm2, %v663_v27  ;;  %v1289_v27 = vld [vmem:[%s3643_s6 + $0x20] sm:$0xff] }
 0x4b6   : > { %2724 = vmatprep.mubr.msk.f32.mxu1 %vm3098_vm1, %v3099_v15 }
 0x4b8   : > { %v832_v28 = vpop.permute.xlu1 %831 }
 0x4b9   : > { %2723 = vmatpush3.msra.mxu1 %v832_v28 }
 0x4ba   : > { %2732 = vmatprep.subr.mxu1 %v3099_v15 }
 0x4d8   : > { %v828_v29 = vpop.xlane.xlu0 %827 }
 0x4d9   : > { %3000 = vrcp.f32 %v828_v29  ;;  %v1291_v29 = vld [vmem:[%s3643_s6 + $0x30] sm:$0xff] }
 0x4da   : > { %3002 = vrcp.f32 %v995_v26  ;;  %v1290_v26 = vld [vmem:[%s3643_s6 + $0x28] sm:$0xff] }
 0x4db   : > { %v2895_v28 = vpack.c.bf16 %v1290_v26, %v1289_v27 }
 0x4dc   : > { %v999_v33 = vpop.permute.xlu0 %998 }
 0x4e3   : > { %v3001_v30 = vpop.eup %3000 }
 0x4e4   : > { %v830_v31 = vmul.f32 %v3001_v30, %v2995_v16  ;;  %v3003_v32 = vpop.eup %3002  ;;  %v1292_v30 = vld [vmem:[%s3643_s6 + $0x38] sm:$0xff] }
 0x4e5   : > { %v997_v34 = vmul.f32 %v3003_v32, %v2993_v9  ;;  %v2558_v32 = vld [vmem:[%s3639_s2 + $0x1] ss:$0 sm:$0xff] }
 0x4e6   : > { %2725 = vmatmul.mubr.msk.f32.vlgmr.msra.gmra.mrb[8].mxu1 %vm403_vm2, %v830_v31  ;;  %v2898_v31 = vpack.c.bf16 %v1292_v30, %v1291_v29 }
 0x4e7   : > { %2733 = vmatpush3.msra.mxu1 %v999_v33  ;;  %2734 = vmatprep.mubr.msk.f32.mxu1 %vm3098_vm1, %v3099_v15 }
 0x4e8   : > { %2882 = vmatprep.subr.bf16.mxu1 %v3097_v11 }
 0x4ea   : > { %2735 = vmatmul.mubr.msk.f32.vlgmr.msra.gmra.mrb[10].mxu1 %vm403_vm2, %v997_v34 }
 0x4eb   : > { %2756 = vmatprep.mubr.msk.f32.mxu1 %vm3098_vm1, %v3099_v15 }
 0x584   : > { %v569_v39 = vpop.f32.mrb[4].mxu1 }
 0x585   : > { %v2706_v40 = vpop.f32.mrb[5].mxu1 }
 0x588   : > { %v736_v41 = vpop.f32.mrb[6].mxu1 }
 0x589   : > { %1075 = vrot.lane.b32.xlu1 %v736_v41, %s3651_s16  ;;  %v2716_v42 = vpop.f32.mrb[7].mxu1  ;;  %s3662_s16 = smov 8  }
 0x5b9   : > { %v903_v46 = vpop.f32.mrb[8].mxu1 }
 0x5ba   : > { %1079 = vrot.lane.b32.xlu0 %v903_v46, %s3650_s17  ;;  %v2726_v47 = vpop.f32.mrb[9].mxu1  ;;  %v2560_v46 = vld [vmem:[%s3639_s2 + $0x3] ss:$0 sm:$0xff]  ;;  %s278_s17 = sand.u32 1, %s3086_s25  }
 0x5bd   : > { %v1070_v48 = vpop.f32.mrb[10].mxu1 }
 0x5be   : > { %1083 = vrot.lane.b32.xlu1 %v1070_v48, %s3649_s14  ;;  %v2736_v49 = vpop.f32.mrb[11].mxu1  ;;  %s3656_s14 = smov 72  }
 0x5fb   : > { %v1076_v50 = vpop.permute.xlu1 %1075 }
 0x5fc   : > { %v1086_v52 = vsel %vm403_vm2, %v569_v39, %v1076_v50 }
 0x62c   : > { %v1080_v51 = vpop.permute.xlu0 %1079 }
 0x62d   : > { %v1088_v53 = vsel %vm1087_vm3, %v1086_v52, %v1080_v51 }
 0x630   : > { %v1084_v54 = vpop.permute.xlu1 %1083 }
 0x631   : > { %v1090_v55 = vsel %vm1089_vm4, %v1088_v53, %v1084_v54 }
 0x632   : > { %2746 = vmatmul.mubr.msk.f32.vlgmr.msra.gmra.mrb[6].mxu0 %vm290_vm0, %v1090_v55 }
 0x633   : > { %2775 = vmatprep.mubr.msk.f32.mxu0 %vm3098_vm1, %v3099_v15  ;;  %2890 = vmatpush3.bf16.msra.mxu0 %v2889_v21 }
 0x634   : > { %2891 = vmatprep.subr.bf16.mxu0 %v3097_v11 }
 0x637   : > { %2893 = vmatpush3.bf16.msra.mxu0 %v2892_v25 }
 0x638   : > { %2894 = vmatprep.subr.bf16.mxu0 %v3097_v11 }
 0x63b   : > { %2896 = vmatpush3.bf16.msra.mxu0 %v2895_v28 }
 0x63c   : > { %2897 = vmatprep.subr.bf16.mxu0 %v3097_v11 }
 0x63f   : > { %2899 = vmatpush3.bf16.msra.mxu0 %v2898_v31 }
 0x640   : > { %2799 = vmatprep.subr.mxu0 %v3099_v15 }
 0x705   : > { %v1168_v57 = vpop.f32.mrb[6].mxu0 }
 0x706   : > { %v1169_v58 = vadd.f32 %v2556_v56, %v1168_v57  ;;  %v2747_v59 = vpop.f32.mrb[7].mxu0  ;;  %v2566_v57 = vld [vmem:[%s3640_s3 + $0x20] sm:$0xff] }
 0x708   : > { %v1172_v60 = vadd.f32 %v1169_v58, %v3236_v23  ;;  %v1196_v23 = vld [vmem:[%s3642_s5 + $0x8] sm:$0xff] }
 0x709   : > { %v2883_v4 = vpack.c.bf16 %v1196_v23, %v1195_v3  ;;  %v2567_v58 = vld [vmem:[%s3640_s3 + $0x28] sm:$0xff] }
 0x70a   : > { %v1173_v61 = vsel %vm290_vm0, %v1172_v60, 0.0  ;;  %v2901_v59 = vpack.c.bf16 %v2567_v58, %v2566_v57 }
 0x70b   : > { %1174 = vadd.xlane.f32.xlu0 %v1173_v61  ;;  %2884 = vmatpush3.bf16.msra.mxu1 %v2883_v4  ;;  %v2569_v61 = vld [vmem:[%s3640_s3 + $0x38] sm:$0xff] }
 0x70c   : > { %2885 = vmatprep.subr.bf16.mxu1 %v3097_v11 }
 0x70f   : > { %2887 = vmatpush3.bf16.msra.mxu1 %v2886_v7  ;;  %v2570_v7 = vld [vmem:[%s3639_s2 + $0x8] ss:$0 sm:$0xff] }
 0x710   : > { %2900 = vmatprep.subr.bf16.mxu1 %v3097_v11 }
 0x721   : > { %1187 = vrot.lane.b32.xlu0 %v2556_v56, %s3096_s20 }
 0x798   : > { %v1175_v62 = vpop.xlane.xlu0 %1174 }
 0x799   : > { %v1176_v63 = vmul.f32 0.03125, %v1175_v62 }
 0x79b   : > { %v1177_v0 = vsub.f32 %v1172_v60, %v1176_v63  ;;  %v2568_v60 = vld [vmem:[%s3640_s3 + $0x30] sm:$0xff] }
 0x79c   : > { %v1188_v13 = vpop.permute.xlu0 %1187  ;;  %v2904_v62 = vpack.c.bf16 %v2569_v61, %v2568_v60 }
 0x79d   : > { %v1178_v1 = vmul.f32 %v1177_v0, %v1177_v0 }
 0x79f   : > { %v1179_v2 = vsel %vm290_vm0, %v1178_v1, 0.0 }
 0x7a0   : > { %1180 = vadd.xlane.f32.xlu1 %v1179_v2 }
 0x7b1   : > { %1191 = vrot.lane.b32.xlu1 %v2556_v56, %s3107_s15 }
 0x82d   : > { %v1181_v8 = vpop.xlane.xlu1 %1180 }
 0x82e   : > { %v1182_v9 = vmul.f32 0.03125, %v1181_v8 }
 0x830   : > { %v1183_v10 = vadd.f32 1e-12, %v1182_v9 }
 0x831   : > { %v1192_v16 = vpop.permute.xlu1 %1191 }
 0x832   : > { %3004 = vrsqrt.f32 %v1183_v10 }
 0x83c   : > { %v3005_v12 = vpop.eup %3004 }
 0x83d   : > { %v1185_v14 = vmul.f32 %v3005_v12, %v1177_v0 }
 0x83f   : > { %v1190_v17 = vmul.f32 %v1188_v13, %v1185_v14 }
 0x841   : > { %v1194_v18 = vadd.f32 %v1192_v16, %v1190_v17 }
 0x843   : > { %2757 = vmatmul.mubr.msk.f32.vlgmr.msra.gmra.mrb[12].mxu1 %vm290_vm0, %v1194_v18 }
 0x844   : > { %2786 = vmatprep.mubr.msk.f32.mxu1 %vm3098_vm1, %v3099_v15  ;;  %2902 = vmatpush3.bf16.msra.mxu1 %v2901_v59 }
 0x845   : > { %2903 = vmatprep.subr.bf16.mxu1 %v3097_v11 }
 0x848   : > { %2905 = vmatpush3.bf16.msra.mxu1 %v2904_v62 }
 0x849   : > { %2789 = vmatprep.subr.mxu1 %v3099_v15 }
 0x916   : > { %v1272_v33 = vpop.f32.mrb[12].mxu1 }
 0x917   : > { %v1273_v34 = vadd.f32 %v2558_v32, %v1272_v33  ;;  %v2758_v35 = vpop.f32.mrb[13].mxu1 }
 0x919   : > { %v1277_v36 = vmul.f32 0.044715, %v1273_v34  ;;  %v1276_v43 = vmul.f32 0.5, %v1273_v34 }
 0x91b   : > { %v1278_v37 = vmul.f32 %v1277_v36, %v1273_v34 }
 0x91d   : > { %v1279_v39 = vmul.f32 %v1278_v37, %v1273_v34 }
 0x91f   : > { %v1280_v40 = vadd.f32 %v1279_v39, %v1273_v34 }
 0x921   : > { %v1281_v41 = vmul.f32 0.7978846, %v1280_v40 }
 0x923   : > { %3006 = vtanh.f32 %v1281_v41 }
 0x92d   : > { %v3007_v42 = vpop.eup %3006 }
 0x92e   : > { %v1283_v44 = vadd.f32 1.0, %v3007_v42 }
 0x930   : > { %v1284_v45 = vmul.f32 %v1283_v44, %v1276_v43 }
 0x932   : > { %2776 = vmatmul.mubr.msk.f32.vlgmr.msra.gmra.mrb[8].mxu0 %vm1297_vm5, %v1284_v45 }
 0x933   : > { %2801 = vmatprep.mubr.msk.f32.mxu0 %vm3098_vm1, %v3099_v15 }
 0xa05   : > { %v1367_v47 = vpop.f32.mrb[8].mxu0 }
 0xa06   : > { %v1368_v48 = vadd.f32 %v2560_v46, %v1367_v47  ;;  %v2777_v49 = vpop.f32.mrb[9].mxu0 }
 0xa08   : > { %v1371_v50 = vadd.f32 %v1368_v48, %v1194_v18 }
 0xa0a   : > { %v1372_v51 = vsel %vm290_vm0, %v1371_v50, 0.0 }
 0xa0b   : > { %1373 = vadd.xlane.f32.xlu0 %v1372_v51 }
 0xa21   : > { %1386 = vrot.lane.b32.xlu0 %v2560_v46, %s3096_s20 }
 0xa98   : > { %v1374_v52 = vpop.xlane.xlu0 %1373 }
 0xa99   : > { %v1375_v53 = vmul.f32 0.03125, %v1374_v52 }
 0xa9b   : > { %v1376_v54 = vsub.f32 %v1371_v50, %v1375_v53 }
 0xa9c   : > { %v1387_v3 = vpop.permute.xlu0 %1386 }
 0xa9d   : > { %v1377_v55 = vmul.f32 %v1376_v54, %v1376_v54 }
 0xa9f   : > { %v1378_v56 = vsel %vm290_vm0, %v1377_v55, 0.0 }
 0xaa0   : > { %1379 = vadd.xlane.f32.xlu1 %v1378_v56 }
 0xab1   : > { %1390 = vrot.lane.b32.xlu1 %v2560_v46, %s3107_s15 }
 0xb2d   : > { %v1380_v63 = vpop.xlane.xlu1 %1379 }
 0xb2e   : > { %v1381_v0 = vmul.f32 0.03125, %v1380_v63 }
 0xb30   : > { %v1382_v1 = vadd.f32 1e-12, %v1381_v0 }
 0xb31   : > { %v1391_v4 = vpop.permute.xlu1 %1390 }
 0xb32   : > { %3008 = vrsqrt.f32 %v1382_v1 }
 0xb3c   : > { %v3009_v2 = vpop.eup %3008 }
 0xb3d   : > { %v1384_v23 = vmul.f32 %v3009_v2, %v1376_v54 }
 0xb3f   : > { %v1389_v5 = vmul.f32 %v1387_v3, %v1384_v23 }
 0xb41   : > { %v3424_v6 = vadd.f32 %v1391_v4, %v1389_v5 }
 0xb43   : > { %2787 = vmatmul.mubr.msk.f32.vlgmr.msra.gmra.mrb[14].mxu1 %vm290_vm0, %v3424_v6 }
 0xb44   : > { %2791 = vmatprep.mubr.msk.f32.mxu1 %vm3098_vm1, %v3099_v15 }
 0xc16   : > { %v1477_v8 = vpop.f32.mrb[14].mxu1 }
 0xc17   : > { %v3433_v9 = vadd.f32 %v2570_v7, %v1477_v8  ;;  %v2788_v10 = vpop.f32.mrb[15].mxu1 }
 0xc19   : > { %1650 = vrot.lane.b32.xlu1 %v3433_v9, %s3100_s18  ;;  %1482 = vrot.lane.b32.xlu0 %v3433_v9, %s3096_s20  ;;  %s3659_s18 = smov 56  }
 0xc1d   : > { %1817 = vrot.lane.b32.xlu1 %v3433_v9, %s3102_s21  ;;  %1648 = vrot.lane.b32.xlu0 %v3433_v9, %s3101_s19  ;;  %s3660_s19 = smov 48   ;;  %s3661_s21 = smov 40  }
 0xc21   : > { %1984 = vrot.lane.b32.xlu1 %v3433_v9, %s3656_s14  ;;  %1815 = vrot.lane.b32.xlu0 %v3433_v9, %s3657_s8  ;;  %s279_s14 = scalar_lea.vmem [#allocation2], %s278_s17 }
 0xc22   : > { %s2472_s8 = sshll.u32 %s279_s14, 4  ;;  %s3596_s8 = int_to_ptr.vmem [resolvable:$true] %s2472_s8 }
 0xc25   : > { %1982 = vrot.lane.b32.xlu0 %v3433_v9, %s3658_s9 }
 0xc8b   : > { %v1651_v12 = vpop.permute.xlu1 %1650  ;;  %v1483_v13 = vpop.permute.xlu0 %1482 }
 0xc8c   : > { %2790 = vmatpush3.xpose.msk.msra.mxu1 %vm403_vm2, %v1483_v13  ;;  %2800 = vmatpush3.xpose.msk.msra.mxu0 %vm403_vm2, %v1651_v12 }
 0xc8d   : > { %2809 = vmatprep.subr.mxu0 %v3099_v15  ;;  %2794 = vmatprep.subr.mxu1 %v3099_v15 }
 0xc8f   : > { %v1818_v14 = vpop.permute.xlu1 %1817  ;;  %2792 = vmatmul.mubr.msk.f32.vlgmr.msra.gmra.mrb[16].mxu1 %vm403_vm2, %v3433_v9  ;;  %v1649_v16 = vpop.permute.xlu0 %1648 }
 0xc90   : > { %2802 = vmatmul.mubr.msk.f32.vlgmr.msra.gmra.mrb[10].mxu0 %vm403_vm2, %v1649_v16  ;;  %2796 = vmatprep.mubr.msk.f32.mxu1 %vm3098_vm1, %v3099_v15  ;;  %v2585_v16 = vld [vmem:[%s3641_s4 + $0x28] sm:$0xff] }
 0xc91   : > { %2810 = vmatpush3.xpose.msk.msra.mxu0 %vm403_vm2, %v1818_v14  ;;  %2811 = vmatprep.mubr.msk.f32.mxu0 %vm3098_vm1, %v3099_v15  ;;  %v2584_v14 = vld [vmem:[%s3641_s4 + $0x20] sm:$0xff] }
 0xc92   : > { %2819 = vmatprep.subr.mxu0 %v3099_v15 }
 0xc93   : > { %v1985_v17 = vpop.permute.xlu1 %1984  ;;  %v1816_v18 = vpop.permute.xlu0 %1815 }
 0xc94   : > { %2812 = vmatmul.mubr.msk.f32.vlgmr.msra.gmra.mrb[12].mxu0 %vm403_vm2, %v1816_v18 }
 0xc95   : > { %2820 = vmatpush3.xpose.msk.msra.mxu0 %vm403_vm2, %v1985_v17  ;;  %2821 = vmatprep.mubr.msk.f32.mxu0 %vm3098_vm1, %v3099_v15  ;;  %v2907_v17 = vpack.c.bf16 %v2585_v16, %v2584_v14 }
 0xc96   : > { %2906 = vmatprep.subr.bf16.mxu0 %v3097_v11 }
 0xc97   : > { %v1983_v19 = vpop.permute.xlu0 %1982 }
 0xc98   : > { %2822 = vmatmul.mubr.msk.f32.vlgmr.msra.gmra.mrb[14].mxu0 %vm403_vm2, %v1983_v19 }
 0xc99   : > { %2837 = vmatprep.mubr.msk.f32.mxu0 %vm3098_vm1, %v3099_v15  ;;  %2908 = vmatpush3.bf16.msra.mxu0 %v2907_v17 }
 0xc9a   : > { %2909 = vmatprep.subr.bf16.mxu0 %v3097_v11 }
 0xd62   : > { %v1554_v20 = vpop.f32.mrb[16].mxu1 }
 0xd63   : > { %v1558_v21 = vmul.f32 0.35355338, %v1554_v20  ;;  %v2793_v22 = vpop.f32.mrb[17].mxu1  ;;  %v1722_v24 = vpop.f32.mrb[10].mxu0 }
 0xd64   : > { %v1726_v25 = vmul.f32 0.35355338, %v1722_v24  ;;  %v2803_v27 = vpop.f32.mrb[11].mxu0  ;;  %v2586_v22 = vld [vmem:[%s3641_s4 + $0x30] sm:$0xff]  ;;  %v2587_v24 = vld [vmem:[%s3641_s4 + $0x38] sm:$0xff] }
 0xd65   : > { %v1559_v26 = vadd.f32 %v1558_v21, %v3286_v38 }
 0xd66   : > { %v1727_v28 = vadd.f32 %v1726_v25, %v3286_v38  ;;  %v2910_v25 = vpack.c.bf16 %v2587_v24, %v2586_v22 }
 0xd67   : > { %v1889_v29 = vpop.f32.mrb[12].mxu0  ;;  %v1561_v30 = vsel %vm1560_vm6, %v1559_v26, -inf }
 0xd68   : > { %v1893_v31 = vmul.f32 0.35355338, %v1889_v29  ;;  %v2813_v32 = vpop.f32.mrb[13].mxu0  ;;  %1562 = vmax.xlane.f32.xlu1 %v1561_v30  ;;  %v1728_v33 = vsel %vm1560_vm6, %v1727_v28, -inf  ;;  %2911 = vmatpush3.bf16.msra.mxu0 %v2910_v25 }
 0xd69   : > { %1729 = vmax.xlane.f32.xlu0 %v1728_v33  ;;  %2918 = vmatprep.subr.bf16.mxu0 %v3097_v11 }
 0xd6a   : > { %v1894_v34 = vadd.f32 %v1893_v31, %v3286_v38 }
 0xd6b   : > { %v2056_v35 = vpop.f32.mrb[14].mxu0 }
 0xd6c   : > { %v2060_v36 = vmul.f32 0.35355338, %v2056_v35  ;;  %v2823_v37 = vpop.f32.mrb[15].mxu0  ;;  %v1895_v39 = vsel %vm1560_vm6, %v1894_v34, -inf }
 0xd6d   : > { %1896 = vmax.xlane.f32.xlu0 %v1895_v39 }
 0xd6e   : > { %v2061_v40 = vadd.f32 %v2060_v36, %v3286_v38  ;;  %v2564_v36 = vld [vmem:[%s3639_s2 + $0xa] sm:$0x1] }
 0xd70   : > { %v2062_v41 = vsel %vm1560_vm6, %v2061_v40, -inf }
 0xd71   : > { %2063 = vmax.xlane.f32.xlu1 %v2062_v41 }
 0xd82   : > { %1739 = vrot.lane.b32.xlu1 %v3433_v9, %s3659_s18  ;;  %s3663_s18 = smov 16  }
 0xdf5   : > { %v1563_v42 = vpop.xlane.xlu1 %1562 }
 0xdf6   : > { %v1564_v43 = vsub.f32 %v1559_v26, %v1563_v42  ;;  %v1730_v44 = vpop.xlane.xlu0 %1729 }
 0xdf7   : > { %v1731_v45 = vsub.f32 %v1727_v28, %v1730_v44 }
 0xdf8   : > { %v1565_v46 = vmul.f32 1.442695, %v1564_v43 }
 0xdf9   : > { %v1732_v47 = vmul.f32 1.442695, %v1731_v45 }
 0xdfa   : > { %3010 = vpow2.f32 %v1565_v46  ;;  %v1897_v56 = vpop.xlane.xlu0 %1896 }
 0xdfb   : > { %3012 = vpow2.f32 %v1732_v47  ;;  %v1898_v57 = vsub.f32 %v1894_v34, %v1897_v56  ;;  %v2589_v47 = vld [vmem:[%s3642_s5 + $0x20] sm:$0xff] }
 0xdfd   : > { %v1899_v58 = vmul.f32 1.442695, %v1898_v57 }
 0xdfe   : > { %v2064_v48 = vpop.xlane.xlu1 %2063 }
 0xdff   : > { %v2065_v49 = vsub.f32 %v2061_v40, %v2064_v48 }
 0xe01   : > { %v2066_v50 = vmul.f32 1.442695, %v2065_v49  ;;  %v2591_v49 = vld [vmem:[%s3642_s5 + $0x30] sm:$0xff] }
 0xe02   : > { %v1740_v61 = vpop.permute.xlu1 %1739 }
 0xe03   : > { %3014 = vpow2.f32 %v2066_v50  ;;  %v2592_v50 = vld [vmem:[%s3642_s5 + $0x38] sm:$0xff] }
 0xe04   : > { %v3011_v51 = vpop.eup %3010  ;;  %3016 = vpow2.f32 %v1899_v58 }
 0xe05   : > { %v3013_v38 = vpop.eup %3012  ;;  %v1567_v52 = vsel %vm1560_vm6, %v3011_v51, 0.0 }
 0xe06   : > { %1568 = vadd.xlane.f32.xlu0 %v1567_v52  ;;  %v1734_v53 = vsel %vm1560_vm6, %v3013_v38, 0.0 }
 0xe07   : > { %1735 = vadd.xlane.f32.xlu1 %v1734_v53 }
 0xe0d   : > { %v3015_v54 = vpop.eup %3014 }
 0xe0e   : > { %v2068_v55 = vsel %vm1560_vm6, %v3015_v54, 0.0  ;;  %v3017_v59 = vpop.eup %3016 }
 0xe0f   : > { %2069 = vadd.xlane.f32.xlu1 %v2068_v55  ;;  %v1901_v60 = vsel %vm1560_vm6, %v3017_v59, 0.0 }
 0xe1c   : > { %1572 = vrot.lane.b32.xlu0 %v3433_v9, %s3107_s15 }
 0xe20   : > { %1906 = vrot.lane.b32.xlu1 %v3433_v9, %s3660_s19  ;;  %s3664_s19 = smov 24  }
 0xe3b   : > { %1902 = vadd.xlane.f32.xlu0 %v1901_v60  ;;  %v2594_v60 = vld [vmem:[%s3643_s6 + $0x40] sm:$0xff] }
 0xe51   : > { %2073 = vrot.lane.b32.xlu0 %v3433_v9, %s3661_s21  ;;  %s3032_s21 = scalar_lea.vmem %s3596_s8, 16 }
 0xe52   : > { %p3033_p11 = scmp.ne.s32.totalorder %s3596_s8, %s3032_s21 }
 0xe54   : > { %p3034_p12 = pnand %p3033_p11, %p3192_p5 }
 0xe56   : > { %p3035_p13 = pneg %p3034_p12 }
 0xe93   : > { %v1569_v62 = vpop.xlane.xlu0 %1568 }
 0xe94   : > { %3018 = vrcp.f32 %v1569_v62  ;;  %v1736_v63 = vpop.xlane.xlu1 %1735 }
 0xe95   : > { %3020 = vrcp.f32 %v1736_v63  ;;  %v2596_v63 = vld [vmem:[%s3643_s6 + $0x50] sm:$0xff] }
 0xe97   : > { %v1573_v0 = vpop.permute.xlu0 %1572 }
 0xe98   : > { %2795 = vmatpush3.msra.mxu1 %v1573_v0  ;;  %v2597_v0 = vld [vmem:[%s3643_s6 + $0x58] sm:$0xff] }
 0xe99   : > { %2804 = vmatprep.subr.mxu1 %v3099_v15 }
 0xe9c   : > { %v2070_v3 = vpop.xlane.xlu1 %2069 }
 0xe9e   : > { %v3019_v1 = vpop.eup %3018 }
 0xe9f   : > { %v1571_v2 = vmul.f32 %v3019_v1, %v3011_v51  ;;  %v3021_v23 = vpop.eup %3020  ;;  %v2916_v51 = vpack.c.bf16 %v2592_v50, %v2591_v49  ;;  %v2922_v1 = vpack.c.bf16 %v2597_v0, %v2596_v63 }
 0xea0   : > { %v1738_v4 = vmul.f32 %v3021_v23, %v3013_v38  ;;  %v1907_v5 = vpop.permute.xlu1 %1906 }
 0xea1   : > { %2797 = vmatmul.mubr.msk.f32.vlgmr.msra.gmra.mrb[18].mxu1 %vm403_vm2, %v1571_v2  ;;  %v2598_v2 = vld [vmem:[%s3643_s6 + $0x60] sm:$0xff] }
 0xea2   : > { %2805 = vmatpush3.msra.mxu1 %v1740_v61  ;;  %2806 = vmatprep.mubr.msk.f32.mxu1 %vm3098_vm1, %v3099_v15  ;;  %v2595_v61 = vld [vmem:[%s3643_s6 + $0x48] sm:$0xff] }
 0xea3   : > { %2814 = vmatprep.subr.mxu1 %v3099_v15  ;;  %v2919_v62 = vpack.c.bf16 %v2595_v61, %v2594_v60 }
 0xea5   : > { %2807 = vmatmul.mubr.msk.f32.vlgmr.msra.gmra.mrb[20].mxu1 %vm403_vm2, %v1738_v4  ;;  %v2600_v4 = vld [vmem:[%s3643_s6 + $0x70] sm:$0xff] }
 0xea6   : > { %2815 = vmatpush3.msra.mxu1 %v1907_v5  ;;  %2816 = vmatprep.mubr.msk.f32.mxu1 %vm3098_vm1, %v3099_v15  ;;  %v2601_v5 = vld [vmem:[%s3643_s6 + $0x78] sm:$0xff] }
 0xea7   : > { %2824 = vmatprep.subr.mxu1 %v3099_v15 }
 0xec8   : > { %v1903_v7 = vpop.xlane.xlu0 %1902 }
 0xec9   : > { %3022 = vrcp.f32 %v1903_v7  ;;  %v2928_v7 = vpack.c.bf16 %v2601_v5, %v2600_v4 }
 0xeca   : > { %3024 = vrcp.f32 %v2070_v3  ;;  %v2599_v3 = vld [vmem:[%s3643_s6 + $0x68] sm:$0xff] }
 0xecb   : > { %v2925_v23 = vpack.c.bf16 %v2599_v3, %v2598_v2 }
 0xecc   : > { %v2074_v12 = vpop.permute.xlu0 %2073 }
 0xed3   : > { %v3023_v8 = vpop.eup %3022 }
 0xed4   : > { %v1905_v9 = vmul.f32 %v3023_v8, %v3017_v59  ;;  %v3025_v10 = vpop.eup %3024  ;;  %v2563_v8 = vld [vmem:[%s3639_s2 + $0x9] sm:$0x1] }
 0xed5   : > { %v2072_v13 = vmul.f32 %v3025_v10, %v3015_v54 }
 0xed6   : > { %2817 = vmatmul.mubr.msk.f32.vlgmr.msra.gmra.mrb[22].mxu1 %vm403_vm2, %v1905_v9 }
 0xed7   : > { %2825 = vmatpush3.msra.mxu1 %v2074_v12  ;;  %2826 = vmatprep.mubr.msk.f32.mxu1 %vm3098_vm1, %v3099_v15 }
 0xed8   : > { %2912 = vmatprep.subr.bf16.mxu1 %v3097_v11 }
 0xeda   : > { %2827 = vmatmul.mubr.msk.f32.vlgmr.msra.gmra.mrb[24].mxu1 %vm403_vm2, %v2072_v13 }
 0xedb   : > { %2848 = vmatprep.mubr.msk.f32.mxu1 %vm3098_vm1, %v3099_v15 }
 0xf74   : > { %v1644_v18 = vpop.f32.mrb[18].mxu1 }
 0xf75   : > { %v2798_v19 = vpop.f32.mrb[19].mxu1 }
 0xf78   : > { %v1811_v20 = vpop.f32.mrb[20].mxu1 }
 0xf79   : > { %2150 = vrot.lane.b32.xlu1 %v1811_v20, %s3662_s16  ;;  %v2808_v21 = vpop.f32.mrb[21].mxu1 }
 0xfa9   : > { %v1978_v27 = vpop.f32.mrb[22].mxu1 }
 0xfaa   : > { %2154 = vrot.lane.b32.xlu0 %v1978_v27, %s3663_s18  ;;  %v2818_v26 = vpop.f32.mrb[23].mxu1 }
 0xfad   : > { %v2145_v28 = vpop.f32.mrb[24].mxu1 }
 0xfae   : > { %2158 = vrot.lane.b32.xlu1 %v2145_v28, %s3664_s19  ;;  %v2828_v29 = vpop.f32.mrb[25].mxu1 }
 0xfeb   : > { %v2151_v30 = vpop.permute.xlu1 %2150 }
 0xfec   : > { %v2161_v32 = vsel %vm403_vm2, %v1644_v18, %v2151_v30 }
0x101c   : > { %v2155_v31 = vpop.permute.xlu0 %2154 }
0x101d   : > { %v2162_v33 = vsel %vm1087_vm3, %v2161_v32, %v2155_v31 }
0x1020   : > { %v2159_v34 = vpop.permute.xlu1 %2158 }
0x1021   : > { %v2163_v35 = vsel %vm1089_vm4, %v2162_v33, %v2159_v34 }
0x1022   : > { %2838 = vmatmul.mubr.msk.f32.vlgmr.msra.gmra.mrb[16].mxu0 %vm290_vm0, %v2163_v35 }
0x1023   : > { %2867 = vmatprep.mubr.msk.f32.mxu0 %vm3098_vm1, %v3099_v15  ;;  %2920 = vmatpush3.bf16.msra.mxu0 %v2919_v62 }
0x1024   : > { %2921 = vmatprep.subr.bf16.mxu0 %v3097_v11 }
0x1027   : > { %2923 = vmatpush3.bf16.msra.mxu0 %v2922_v1 }
0x1028   : > { %2924 = vmatprep.subr.bf16.mxu0 %v3097_v11 }
0x102b   : > { %2926 = vmatpush3.bf16.msra.mxu0 %v2925_v23 }
0x102c   : > { %2927 = vmatprep.subr.bf16.mxu0 %v3097_v11 }
0x102f   : > { %2929 = vmatpush3.bf16.msra.mxu0 %v2928_v7 }
0x10f5   : > { %v2238_v37 = vpop.f32.mrb[16].mxu0 }
0x10f6   : > { %v2239_v39 = vadd.f32 %v2564_v36, %v2238_v37  ;;  %v2839_v40 = vpop.f32.mrb[17].mxu0 }
0x10f8   : > { %v2242_v41 = vadd.f32 %v2239_v39, %v3424_v6  ;;  %v2590_v6 = vld [vmem:[%s3642_s5 + $0x28] sm:$0xff] }
0x10f9   : > { %v2913_v48 = vpack.c.bf16 %v2590_v6, %v2589_v47 }
0x10fa   : > { %v2244_v42 = vsel %vm2243_vm7, %v2242_v41, 0.0 }
0x10fb   : > { %2245 = vadd.xlane.f32.xlu0 %v2244_v42  ;;  %2914 = vmatpush3.bf16.msra.mxu1 %v2913_v48 }
0x10fc   : > { %2915 = vmatprep.subr.bf16.mxu1 %v3097_v11  ;;  %v2565_v11 = vld [vmem:[%s3639_s2 + $0xb] sm:$0x1] }
0x10ff   : > { %2917 = vmatpush3.bf16.msra.mxu1 %v2916_v51 }
0x1111   : > { %2258 = vrot.lane.b32.xlu0 %v2564_v36, %s3096_s20 }
0x1188   : > { %v2246_v43 = vpop.xlane.xlu0 %2245 }
0x1189   : > { %v2247_v44 = vmul.f32 0.03125, %v2246_v43 }
0x118b   : > { %v2248_v45 = vsub.f32 %v2242_v41, %v2247_v44 }
0x118c   : > { %v2259_v55 = vpop.permute.xlu0 %2258 }
0x118d   : > { %v2249_v46 = vmul.f32 %v2248_v45, %v2248_v45 }
0x118f   : > { %v2250_v15 = vsel %vm2243_vm7, %v2249_v46, 0.0 }
0x1190   : > { %2251 = vadd.xlane.f32.xlu1 %v2250_v15 }
0x11a1   : > { %2262 = vrot.lane.b32.xlu1 %v2564_v36, %s3107_s15 }
0x121d   : > { %v2252_v38 = vpop.xlane.xlu1 %2251 }
0x121e   : > { %v2253_v52 = vmul.f32 0.03125, %v2252_v38 }
0x1220   : > { %v2254_v53 = vadd.f32 1e-12, %v2253_v52 }
0x1221   : > { %v2263_v57 = vpop.permute.xlu1 %2262 }
0x1222   : > { %3026 = vrsqrt.f32 %v2254_v53 }
0x122c   : > { %v3027_v54 = vpop.eup %3026 }
0x122d   : > { %v2256_v56 = vmul.f32 %v3027_v54, %v2248_v45 }
0x122f   : > { %v2261_v58 = vmul.f32 %v2259_v55, %v2256_v56 }
0x1231   : > { %v2265_v59 = vadd.f32 %v2263_v57, %v2261_v58 }
0x1233   : > { %2849 = vmatmul.mubr.msk.f32.vlgmr.msra.gmra.mrb[26].mxu1 %vm290_vm0, %v2265_v59 }
0x1306   : > { %v2340_v9 = vpop.f32.mrb[26].mxu1 }
0x1307   : > { %v2341_v10 = vadd.f32 %v2563_v8, %v2340_v9  ;;  %v2850_v12 = vpop.f32.mrb[27].mxu1 }
0x1309   : > { %v2345_v13 = vmul.f32 0.044715, %v2341_v10  ;;  %v2344_v20 = vmul.f32 0.5, %v2341_v10 }
0x130b   : > { %v2346_v14 = vmul.f32 %v2345_v13, %v2341_v10 }
0x130d   : > { %v2347_v16 = vmul.f32 %v2346_v14, %v2341_v10 }
0x130f   : > { %v2348_v17 = vadd.f32 %v2347_v16, %v2341_v10 }
0x1311   : > { %v2349_v18 = vmul.f32 0.7978846, %v2348_v17 }
0x1313   : > { %3028 = vtanh.f32 %v2349_v18 }
0x131d   : > { %v3029_v19 = vpop.eup %3028 }
0x131e   : > { %v2351_v21 = vadd.f32 1.0, %v3029_v19 }
0x1320   : > { %v2352_v22 = vmul.f32 %v2351_v21, %v2344_v20 }
0x1322   : > { %2868 = vmatmul.mubr.msk.f32.vlgmr.msra.gmra.mrb[18].mxu0 %vm1297_vm5, %v2352_v22 }
0x13f5   : > { %v2431_v24 = vpop.f32.mrb[18].mxu0 }
0x13f6   : > { %v2432_v25 = vadd.f32 %v2565_v11, %v2431_v24  ;;  %v2869_v27 = vpop.f32.mrb[19].mxu0 }
0x13f8   : > { %v2435_v26 = vadd.f32 %v2432_v25, %v2265_v59 }
0x13fa   : > { %v2436_v28 = vsel %vm2243_vm7, %v2435_v26, 0.0 }
0x13fb   : > { %2437 = vadd.xlane.f32.xlu0 %v2436_v28 }
0x1411   : > { %2450 = vrot.lane.b32.xlu0 %v2565_v11, %s3096_s20  ;;  %s2603_s20 = sshll.u32 %s3175_s28, 4  ;;  %s3113_s28 = smov [#allocation2]  }
0x1412   : > { %s3594_s19 = scalar_lea.hbm %s3644_s7, %s2603_s20  ;;  %s3036_s29 = sshll.u32 %s3113_s28, 4  ;;  %s3037_s29 = int_to_ptr.vmem [resolvable:$false] %s3036_s29 }
0x1413   : > { %s3038_s23 = scalar_lea.vmem %s3037_s29, 32  ;;  %p3039_p0 = scmp.lt.s32.totalorder %s3596_s8, %s3037_s29 }
0x1414   : > { %p3040_p1 = scmp.lt.s32.totalorder %s3038_s23, %s3032_s21 }
0x1416   : > { %p3041_p2 = por %p3040_p1, %p3039_p0 }
0x1418   : > { %p3042_p3 = pnand %p3041_p2, %p3035_p13 }
0x1488   : > { %v2438_v29 = vpop.xlane.xlu0 %2437 }
0x1489   : > { %v2439_v30 = vmul.f32 0.03125, %v2438_v29 }
0x148b   : > { %v2440_v31 = vsub.f32 %v2435_v26, %v2439_v30 }
0x148c   : > { %v2451_v39 = vpop.permute.xlu0 %2450 }
0x148d   : > { %v2441_v32 = vmul.f32 %v2440_v31, %v2440_v31 }
0x148f   : > { %v2442_v33 = vsel %vm2243_vm7, %v2441_v32, 0.0 }
0x1490   : > { %2443 = vadd.xlane.f32.xlu1 %v2442_v33 }
0x14a1   : > { %2454 = vrot.lane.b32.xlu1 %v2565_v11, %s3107_s15  ;;  %s2460_s15 = scalar_lea.sflag [#allocation3], %s278_s17 }
0x151d   : > { %v2444_v34 = vpop.xlane.xlu1 %2443 }
0x151e   : > { %v2445_v35 = vmul.f32 0.03125, %v2444_v34 }
0x1520   : > { %v2446_v36 = vadd.f32 1e-12, %v2445_v35 }
0x1521   : > { %v2455_v41 = vpop.permute.xlu1 %2454 }
0x1522   : > { %3030 = vrsqrt.f32 %v2446_v36 }
0x152c   : > { %v3031_v37 = vpop.eup %3030 }
0x152d   : > { %v2448_v40 = vmul.f32 %v3031_v37, %v2440_v31 }
0x152f   : > { %v2453_v42 = vmul.f32 %v2451_v39, %v2448_v40 }
0x1531   : > { %v2457_v43 = vadd.f32 %v2455_v41, %v2453_v42 }
0x1533   : > { %2458 = vst.msk [vmem:[%s279_s14] sm:$0x1] %vm2243_vm7, %v2457_v43 }
0x1534   : > { %3045 = shalt.err (!%p3042_p3)
}
0x1535   : > { %s3046_s13 = scalar_lea.hbm %s3594_s19, 16  ;;  %s3050_s17 = scalar_lea.hbm %s3644_s7, 32 }
0x1536   : > { %p3047_p4 = scmp.ne.s32.totalorder %s3594_s19, %s3046_s13  ;;  %p3051_p9 = scmp.lt.u32.totalorder %s3594_s19, %s3644_s7 }
0x1537   : > { %p3052_p10 = scmp.lt.u32.totalorder %s3050_s17, %s3046_s13  ;;  %p3054_p12 = scmp.lt.u32.totalorder %s3046_s13, %s3594_s19 }
0x1538   : > { %p3048_p7 = pnand %p3047_p4, %p3192_p5 }
0x1539   : > { %p3053_p11 = por %p3052_p10, %p3051_p9 }
0x153a   : > { %p3049_p8 = pneg %p3048_p7 }
0x153b   : > { %p3055_p13 = por %p3054_p12, %p3053_p11 }
0x153d   : > { %p3056_p0 = pnand %p3055_p13, %p3049_p8 }
0x153f   : > { %3059 = shalt.err (!%p3056_p0)
}
0x1540   : > { %2930 = dma.vmem_to_hbm [thread:$0]  (%p3192_p5), %s3596_s8, 16, %s3594_s19, %s2460_s15  }
0x1541 PF: > { %p2936_p1 = scmp.ge.s32.totalorder %s3094_s27, 2  ;;  %s2484_s9 = sand.u32 1, %s3082_s24  }
0x1542   : > { %s2485_s18 = scalar_lea.sflag [#allocation3], %s2484_s9 }
0x1543   : > { %p2933_p2 = pnand %p2936_p1, %p3196_p6 }
0x1545   : > { %3077 = dma.done.wait (!%p2933_p2), %s2485_s18, 16  }
0x1546   : > { %3079 = vsyncadd (!%p2933_p2), %s2485_s18, 4294967280  ;;  %p17_p3 = scmp.ge.s32.totalorder %s3179_s30, 4   ;;  %s3665_s24 = smov %s3086_s25 }
0x1547   : > { %s3666_s25 = smov %s3090_s26  ;;  %s3667_s26 = smov %s3190_s10 }
0x1548   : > { %s3668_s27 = smov %s3179_s30  ;;  %19 = sbr.rel (!%p17_p3) target bundleno = 3 (0x3), region = 91 }
0x154f   :  { %2489 = vsyncpa [#allocation3], 1 }
0x1550   :  { %2491 = vsyncpa [#allocation3 + $0x1], 1 }

</bundles_post_ra>
